<compile_context>
chip_gen: v7x
topology: tpu7x:2x2x1
jax: 0.10.0
libtpu: 0.0.40
codegen_flags: <defaults>
</compile_context>

<pallas_src>
import numpy as np
import jax
import jax.numpy as jnp
from jax.experimental import pallas as pl
from jax.experimental.pallas import tpu as pltpu


def _augmix_kernel(ws_ref, m_ref, netflip_ref, opflag_ref, bright_ref,
                   contrast_ref, x_ref, xf_ref, out_ref, aug_ref):
    # ws_ref:       SMEM (width,)        f32  dirichlet weights
    # m_ref:        SMEM (1,)            f32  beta mixing coefficient
    # netflip_ref:  SMEM (width,)        i32  XOR of flip coins per branch
    # opflag_ref:   SMEM (width*depth,)  i32  1 = ColorJitter step, 0 = identity
    # bright_ref:   SMEM (width*depth,)  f32  brightness factors
    # contrast_ref: SMEM (width*depth,)  f32  contrast factors
    # x_ref:        VMEM (Bt, C*H*W)     image block, lane-dense
    # xf_ref:       VMEM (Bt, C*H*W)     W-flipped image block
    # aug_ref:      VMEM (Bt, C*H*W) f32 scratch holding the current chain value
    width = ws_ref.shape[0]
    depth = opflag_ref.shape[0] // width

    x = x_ref[...].astype(jnp.float32)
    xf = xf_ref[...].astype(jnp.float32)

    # Hoisted per-image mean (flip-invariant), reused for every branch's first
    # jitter step: mean(b * start_img) = b * mean(img).
    mean0 = jnp.mean(x, axis=-1, keepdims=True)          # (Bt, 1)

    m = m_ref[0]
    one_minus_m = 1.0 - m

    mix = jnp.zeros_like(x)
    for i in range(width):                                # static, small
        # Net horizontal flip for this branch applied as input selection.
        aug_ref[...] = jnp.where(netflip_ref[i] > 0, xf, x)

        for d in range(depth):                            # static, small
            k = i * depth + d

            @pl.when(opflag_ref[k] != 0)                  # only jitter steps do work
            def _():
                b = bright_ref[k]
                c = contrast_ref[k]
                a = aug_ref[...] * b                      # brightness
                if d == 0:
                    mu = b * mean0                        # hoisted reduction
                else:
                    mu = jnp.mean(a, axis=-1, keepdims=True)   # per-image mean
                # contrast blend + clamp
                aug_ref[...] = jnp.clip(c * a + (1.0 - c) * mu, 0.0, 1.0)
            # flip handled above; RandomCrop -> identity (see TODO).

        mix = mix + ws_ref[i] * aug_ref[...]

    out_ref[...] = (one_minus_m * x + m * mix).astype(out_ref.dtype)


def _choose_block_images(batch, per_img_bytes, target_bytes=1 << 20):
    """Images per block: ~1 MiB blocks, multiple of 8 rows, >=2 grid steps."""
    if batch < 8:
        return batch                       # single block; full-dim exemption
    bt_cap = max(8, min(batch, target_bytes // per_img_bytes))
    n_blocks = max(2, pl.cdiv(batch, bt_cap))       # >=2 steps for v7x megacore
    bt = pl.cdiv(pl.cdiv(batch, n_blocks), 8) * 8   # round up to sublane multiple
    return max(8, min(bt, batch))


def augmix_forward(img, ws, m, netflip, opflag, bright, contrast):
    B, C, H, W = img.shape
    chw = C * H * W

    # Lane-dense layout: last (lane) dim is C*H*W instead of W.
    x2 = img.reshape(B, chw)
    # Pre-flipped copy (cheap XLA op outside the kernel); the kernel applies
    # the flip as a scalar-gated select instead of a lane permutation.
    xf2 = jnp.flip(img, axis=-1).reshape(B, chw)

    bt = _choose_block_images(B, chw * jnp.dtype(img.dtype).itemsize)
    n_blocks = pl.cdiv(B, bt)
    bp = n_blocks * bt
    if bp != B:                                           # pad batch to block multiple
        pad = ((0, bp - B), (0, 0))
        x2 = jnp.pad(x2, pad)
        xf2 = jnp.pad(xf2, pad)

    smem = pl.BlockSpec(memory_space=pltpu.SMEM)
    img_spec = pl.BlockSpec((bt, chw), lambda b: (b, 0))

    out2 = pl.pallas_call(
        _augmix_kernel,
        out_shape=jax.ShapeDtypeStruct((bp, chw), img.dtype),
        grid=(n_blocks,),
        in_specs=[smem, smem, smem, smem, smem, smem, img_spec, img_spec],
        out_specs=img_spec,
        scratch_shapes=[pltpu.VMEM((bt, chw), jnp.float32)],
        compiler_params=pltpu.CompilerParams(
            dimension_semantics=("parallel",)),
    )(ws, m, netflip, opflag, bright, contrast, x2, xf2)

    return out2[:B].reshape(B, C, H, W)


def sample_augmix_params(severity=3, width=3, depth=-1, alpha=1.0, seed=0):
    """Deterministically sample everything the PyTorch module samples on host."""
    rng = np.random.default_rng(seed)
    if depth <= 0:
        depth = int(rng.integers(1, 3))      # np.random.randint(1, 3) in __init__
    ws = rng.dirichlet([alpha] * width).astype(np.float32)
    m = np.array([rng.beta(alpha, alpha)], np.float32)

    jit_rng = 0.8 * severity                 # ColorJitter brightness/contrast range
    netflip = np.zeros((width,), np.int32)           # XOR of flip coins per branch
    opflag = np.zeros((width * depth,), np.int32)    # 1 = ColorJitter step
    bright = np.ones((width * depth,), np.float32)
    contrast = np.ones((width * depth,), np.float32)
    for i in range(width):
        for d in range(depth):
            k = i * depth + d
            op = int(rng.integers(0, 3))     # random.choice(self.augmentations)
            if op == 0:                      # ColorJitter (brightness + contrast)
                opflag[k] = 1
                bright[k] = rng.uniform(max(0.0, 1.0 - jit_rng), 1.0 + jit_rng)
                contrast[k] = rng.uniform(max(0.0, 1.0 - jit_rng), 1.0 + jit_rng)
            elif op == 1:                    # RandomHorizontalFlip, p = 0.5
                netflip[i] ^= int(rng.integers(0, 2))
            # op == 2: RandomCrop -> identity (see TODO at top)
    return ws, m, netflip, opflag, bright, contrast


if __name__ == "__main__":
    B, C, H, W = 16, 3, 16, 16
    key = jax.random.PRNGKey(0)
    img = jax.random.uniform(key, (B, C, H, W), dtype=jnp.float32)

    # depth fixed to 2 (within the module's depth in {1, 2} when depth=-1) so
    # the demo parameter shapes are deterministic.
    ws, m, netflip, opflag, bright, contrast = sample_augmix_params(
        severity=3, width=3, depth=2, alpha=1.0, seed=0)

    out = augmix_forward(
        img,
        jnp.asarray(ws),
        jnp.asarray(m),
        jnp.asarray(netflip),
        jnp.asarray(opflag),
        jnp.asarray(bright),
        jnp.asarray(contrast),
    )
    out = jax.block_until_ready(out)

    assert out.shape == img.shape and out.dtype == img.dtype
    assert bool(jnp.all(jnp.isfinite(out)))
    print("KERNEL_OK")
</pallas_src>

<mosaic_0001>
module attributes {stable_mosaic.version = 11 : i64} {
  func.func @_augmix_kernel(%arg0: i32, %arg1: memref<3xf32, #tpu.memory_space<smem>>, %arg2: memref<1xf32, #tpu.memory_space<smem>>, %arg3: memref<3xi32, #tpu.memory_space<smem>>, %arg4: memref<6xi32, #tpu.memory_space<smem>>, %arg5: memref<6xf32, #tpu.memory_space<smem>>, %arg6: memref<6xf32, #tpu.memory_space<smem>>, %arg7: memref<8x768xf32, #tpu.memory_space<vmem>>, %arg8: memref<8x768xf32, #tpu.memory_space<vmem>>, %arg9: memref<8x768xf32, #tpu.memory_space<vmem>>, %arg10: memref<8x768xf32, #tpu.memory_space<vmem>>) attributes {dimension_semantics = [#tpu.dimension_semantics<parallel>], iteration_bounds = array<i64: 2>, scalar_prefetch = 0 : i64, scratch_operands = 1 : i64, tpu.core_type = #tpu.core_type<tc>, window_params = [{transform_indices = @transform_0, window_bounds = array<i64: 3>}, {transform_indices = @transform_1, window_bounds = array<i64: 1>}, {transform_indices = @transform_2, window_bounds = array<i64: 3>}, {transform_indices = @transform_3, window_bounds = array<i64: 6>}, {transform_indices = @transform_4, window_bounds = array<i64: 6>}, {transform_indices = @transform_5, window_bounds = array<i64: 6>}, {transform_indices = @transform_6, window_bounds = array<i64: 8, 768>}, {transform_indices = @transform_7, window_bounds = array<i64: 8, 768>}, {transform_indices = @transform_8, window_bounds = array<i64: 8, 768>}]} {
    %c0 = arith.constant 0 : index
    %c0_0 = arith.constant 0 : index
    %0 = vector.load %arg7[%c0, %c0_0] : memref<8x768xf32, #tpu.memory_space<vmem>>, vector<8x768xf32>
    %c0_1 = arith.constant 0 : index
    %c0_2 = arith.constant 0 : index
    %1 = vector.load %arg8[%c0_1, %c0_2] : memref<8x768xf32, #tpu.memory_space<vmem>>, vector<8x768xf32>
    %cst = arith.constant dense<0.000000e+00> : vector<8xf32>
    %2 = vector.multi_reduction <add>, %0, %cst [1] : vector<8x768xf32> to vector<8xf32>
    %3 = vector.shape_cast %2 : vector<8xf32> to vector<8x1xf32>
    %cst_3 = arith.constant 7.680000e+02 : f32
    %4 = vector.broadcast %cst_3 : f32 to vector<8x1xf32>
    %5 = arith.divf %3, %4 : vector<8x1xf32>
    %c0_4 = arith.constant 0 : index
    %6 = memref.load %arg2[%c0_4] : memref<1xf32, #tpu.memory_space<smem>>
    %cst_5 = arith.constant 1.000000e+00 : f32
    %7 = arith.subf %cst_5, %6 : f32
    %cst_6 = arith.constant 0.000000e+00 : f32
    %8 = vector.broadcast %cst_6 : f32 to vector<8x768xf32>
    %c0_7 = arith.constant 0 : index
    %9 = memref.load %arg3[%c0_7] : memref<3xi32, #tpu.memory_space<smem>>
    %c0_i32 = arith.constant 0 : i32
    %10 = arith.cmpi sgt, %9, %c0_i32 : i32
    %11 = arith.select %10, %1, %0 : vector<8x768xf32>
    %c0_8 = arith.constant 0 : index
    %c0_9 = arith.constant 0 : index
    %12 = vector.load %arg10[%c0_8, %c0_9] : memref<8x768xf32, #tpu.memory_space<vmem>>, vector<8x768xf32>
    tpu.vector_store %arg10[%c0_8, %c0_9], %11 {strides = array<i32>} : memref<8x768xf32, #tpu.memory_space<vmem>>, vector<8x768xf32>,
    %c0_10 = arith.constant 0 : index
    %13 = memref.load %arg4[%c0_10] : memref<6xi32, #tpu.memory_space<smem>>
    %c0_i32_11 = arith.constant 0 : i32
    %14 = arith.cmpi ne, %13, %c0_i32_11 : i32
    %15 = arith.extui %14 : i1 to i32
    %c0_i32_12 = arith.constant 0 : i32
    %16 = arith.cmpi ne, %15, %c0_i32_12 : i32
    scf.if %16 {
      %c0_42 = arith.constant 0 : index
      %66 = memref.load %arg5[%c0_42] : memref<6xf32, #tpu.memory_space<smem>>
      %c0_43 = arith.constant 0 : index
      %67 = memref.load %arg6[%c0_43] : memref<6xf32, #tpu.memory_space<smem>>
      %c0_44 = arith.constant 0 : index
      %c0_45 = arith.constant 0 : index
      %68 = vector.load %arg10[%c0_44, %c0_45] : memref<8x768xf32, #tpu.memory_space<vmem>>, vector<8x768xf32>
      %69 = vector.broadcast %66 : f32 to vector<8x768xf32>
      %70 = arith.mulf %68, %69 : vector<8x768xf32>
      %71 = vector.broadcast %66 : f32 to vector<8x1xf32>
      %72 = arith.mulf %71, %5 : vector<8x1xf32>
      %73 = vector.broadcast %67 : f32 to vector<8x768xf32>
      %74 = arith.mulf %73, %70 : vector<8x768xf32>
      %cst_46 = arith.constant 1.000000e+00 : f32
      %75 = arith.subf %cst_46, %67 : f32
      %76 = vector.broadcast %75 : f32 to vector<8x1xf32>
      %77 = arith.mulf %76, %72 : vector<8x1xf32>
      %78 = vector.broadcast %77 : vector<8x1xf32> to vector<8x768xf32>
      %79 = arith.addf %74, %78 : vector<8x768xf32>
      %cst_47 = arith.constant 0.000000e+00 : f32
      %cst_48 = arith.constant 1.000000e+00 : f32
      %80 = vector.broadcast %cst_47 : f32 to vector<8x768xf32>
      %81 = arith.maximumf %80, %79 : vector<8x768xf32>
      %82 = vector.broadcast %cst_48 : f32 to vector<8x768xf32>
      %83 = arith.minimumf %82, %81 : vector<8x768xf32>
      %c0_49 = arith.constant 0 : index
      %c0_50 = arith.constant 0 : index
      %84 = vector.load %arg10[%c0_49, %c0_50] : memref<8x768xf32, #tpu.memory_space<vmem>>, vector<8x768xf32>
      tpu.vector_store %arg10[%c0_49, %c0_50], %83 {strides = array<i32>} : memref<8x768xf32, #tpu.memory_space<vmem>>, vector<8x768xf32>,
    } else {
    }
    %c1 = arith.constant 1 : index
    %17 = memref.load %arg4[%c1] : memref<6xi32, #tpu.memory_space<smem>>
    %c0_i32_13 = arith.constant 0 : i32
    %18 = arith.cmpi ne, %17, %c0_i32_13 : i32
    %19 = arith.extui %18 : i1 to i32
    %c0_i32_14 = arith.constant 0 : i32
    %20 = arith.cmpi ne, %19, %c0_i32_14 : i32
    scf.if %20 {
      %c1_42 = arith.constant 1 : index
      %66 = memref.load %arg5[%c1_42] : memref<6xf32, #tpu.memory_space<smem>>
      %c1_43 = arith.constant 1 : index
      %67 = memref.load %arg6[%c1_43] : memref<6xf32, #tpu.memory_space<smem>>
      %c0_44 = arith.constant 0 : index
      %c0_45 = arith.constant 0 : index
      %68 = vector.load %arg10[%c0_44, %c0_45] : memref<8x768xf32, #tpu.memory_space<vmem>>, vector<8x768xf32>
      %69 = vector.broadcast %66 : f32 to vector<8x768xf32>
      %70 = arith.mulf %68, %69 : vector<8x768xf32>
      %cst_46 = arith.constant dense<0.000000e+00> : vector<8xf32>
      %71 = vector.multi_reduction <add>, %70, %cst_46 [1] : vector<8x768xf32> to vector<8xf32>
      %72 = vector.shape_cast %71 : vector<8xf32> to vector<8x1xf32>
      %cst_47 = arith.constant 7.680000e+02 : f32
      %73 = vector.broadcast %cst_47 : f32 to vector<8x1xf32>
      %74 = arith.divf %72, %73 : vector<8x1xf32>
      %75 = vector.broadcast %67 : f32 to vector<8x768xf32>
      %76 = arith.mulf %75, %70 : vector<8x768xf32>
      %cst_48 = arith.constant 1.000000e+00 : f32
      %77 = arith.subf %cst_48, %67 : f32
      %78 = vector.broadcast %77 : f32 to vector<8x1xf32>
      %79 = arith.mulf %78, %74 : vector<8x1xf32>
      %80 = vector.broadcast %79 : vector<8x1xf32> to vector<8x768xf32>
      %81 = arith.addf %76, %80 : vector<8x768xf32>
      %cst_49 = arith.constant 0.000000e+00 : f32
      %cst_50 = arith.constant 1.000000e+00 : f32
      %82 = vector.broadcast %cst_49 : f32 to vector<8x768xf32>
      %83 = arith.maximumf %82, %81 : vector<8x768xf32>
      %84 = vector.broadcast %cst_50 : f32 to vector<8x768xf32>
      %85 = arith.minimumf %84, %83 : vector<8x768xf32>
      %c0_51 = arith.constant 0 : index
      %c0_52 = arith.constant 0 : index
      %86 = vector.load %arg10[%c0_51, %c0_52] : memref<8x768xf32, #tpu.memory_space<vmem>>, vector<8x768xf32>
      tpu.vector_store %arg10[%c0_51, %c0_52], %85 {strides = array<i32>} : memref<8x768xf32, #tpu.memory_space<vmem>>, vector<8x768xf32>,
    } else {
    }
    %c0_15 = arith.constant 0 : index
    %21 = memref.load %arg1[%c0_15] : memref<3xf32, #tpu.memory_space<smem>>
    %c0_16 = arith.constant 0 : index
    %c0_17 = arith.constant 0 : index
    %22 = vector.load %arg10[%c0_16, %c0_17] : memref<8x768xf32, #tpu.memory_space<vmem>>, vector<8x768xf32>
    %23 = vector.broadcast %21 : f32 to vector<8x768xf32>
    %24 = arith.mulf %23, %22 : vector<8x768xf32>
    %25 = arith.addf %8, %24 : vector<8x768xf32>
    %c1_18 = arith.constant 1 : index
    %26 = memref.load %arg3[%c1_18] : memref<3xi32, #tpu.memory_space<smem>>
    %c0_i32_19 = arith.constant 0 : i32
    %27 = arith.cmpi sgt, %26, %c0_i32_19 : i32
    %28 = arith.select %27, %1, %0 : vector<8x768xf32>
    %c0_20 = arith.constant 0 : index
    %c0_21 = arith.constant 0 : index
    %29 = vector.load %arg10[%c0_20, %c0_21] : memref<8x768xf32, #tpu.memory_space<vmem>>, vector<8x768xf32>
    tpu.vector_store %arg10[%c0_20, %c0_21], %28 {strides = array<i32>} : memref<8x768xf32, #tpu.memory_space<vmem>>, vector<8x768xf32>,
    %c2 = arith.constant 2 : index
    %30 = memref.load %arg4[%c2] : memref<6xi32, #tpu.memory_space<smem>>
    %c0_i32_22 = arith.constant 0 : i32
    %31 = arith.cmpi ne, %30, %c0_i32_22 : i32
    %32 = arith.extui %31 : i1 to i32
    %c0_i32_23 = arith.constant 0 : i32
    %33 = arith.cmpi ne, %32, %c0_i32_23 : i32
    scf.if %33 {
      %c2_42 = arith.constant 2 : index
      %66 = memref.load %arg5[%c2_42] : memref<6xf32, #tpu.memory_space<smem>>
      %c2_43 = arith.constant 2 : index
      %67 = memref.load %arg6[%c2_43] : memref<6xf32, #tpu.memory_space<smem>>
      %c0_44 = arith.constant 0 : index
      %c0_45 = arith.constant 0 : index
      %68 = vector.load %arg10[%c0_44, %c0_45] : memref<8x768xf32, #tpu.memory_space<vmem>>, vector<8x768xf32>
      %69 = vector.broadcast %66 : f32 to vector<8x768xf32>
      %70 = arith.mulf %68, %69 : vector<8x768xf32>
      %71 = vector.broadcast %66 : f32 to vector<8x1xf32>
      %72 = arith.mulf %71, %5 : vector<8x1xf32>
      %73 = vector.broadcast %67 : f32 to vector<8x768xf32>
      %74 = arith.mulf %73, %70 : vector<8x768xf32>
      %cst_46 = arith.constant 1.000000e+00 : f32
      %75 = arith.subf %cst_46, %67 : f32
      %76 = vector.broadcast %75 : f32 to vector<8x1xf32>
      %77 = arith.mulf %76, %72 : vector<8x1xf32>
      %78 = vector.broadcast %77 : vector<8x1xf32> to vector<8x768xf32>
      %79 = arith.addf %74, %78 : vector<8x768xf32>
      %cst_47 = arith.constant 0.000000e+00 : f32
      %cst_48 = arith.constant 1.000000e+00 : f32
      %80 = vector.broadcast %cst_47 : f32 to vector<8x768xf32>
      %81 = arith.maximumf %80, %79 : vector<8x768xf32>
      %82 = vector.broadcast %cst_48 : f32 to vector<8x768xf32>
      %83 = arith.minimumf %82, %81 : vector<8x768xf32>
      %c0_49 = arith.constant 0 : index
      %c0_50 = arith.constant 0 : index
      %84 = vector.load %arg10[%c0_49, %c0_50] : memref<8x768xf32, #tpu.memory_space<vmem>>, vector<8x768xf32>
      tpu.vector_store %arg10[%c0_49, %c0_50], %83 {strides = array<i32>} : memref<8x768xf32, #tpu.memory_space<vmem>>, vector<8x768xf32>,
    } else {
    }
    %c3 = arith.constant 3 : index
    %34 = memref.load %arg4[%c3] : memref<6xi32, #tpu.memory_space<smem>>
    %c0_i32_24 = arith.constant 0 : i32
    %35 = arith.cmpi ne, %34, %c0_i32_24 : i32
    %36 = arith.extui %35 : i1 to i32
    %c0_i32_25 = arith.constant 0 : i32
    %37 = arith.cmpi ne, %36, %c0_i32_25 : i32
    scf.if %37 {
      %c3_42 = arith.constant 3 : index
      %66 = memref.load %arg5[%c3_42] : memref<6xf32, #tpu.memory_space<smem>>
      %c3_43 = arith.constant 3 : index
      %67 = memref.load %arg6[%c3_43] : memref<6xf32, #tpu.memory_space<smem>>
      %c0_44 = arith.constant 0 : index
      %c0_45 = arith.constant 0 : index
      %68 = vector.load %arg10[%c0_44, %c0_45] : memref<8x768xf32, #tpu.memory_space<vmem>>, vector<8x768xf32>
      %69 = vector.broadcast %66 : f32 to vector<8x768xf32>
      %70 = arith.mulf %68, %69 : vector<8x768xf32>
      %cst_46 = arith.constant dense<0.000000e+00> : vector<8xf32>
      %71 = vector.multi_reduction <add>, %70, %cst_46 [1] : vector<8x768xf32> to vector<8xf32>
      %72 = vector.shape_cast %71 : vector<8xf32> to vector<8x1xf32>
      %cst_47 = arith.constant 7.680000e+02 : f32
      %73 = vector.broadcast %cst_47 : f32 to vector<8x1xf32>
      %74 = arith.divf %72, %73 : vector<8x1xf32>
      %75 = vector.broadcast %67 : f32 to vector<8x768xf32>
      %76 = arith.mulf %75, %70 : vector<8x768xf32>
      %cst_48 = arith.constant 1.000000e+00 : f32
      %77 = arith.subf %cst_48, %67 : f32
      %78 = vector.broadcast %77 : f32 to vector<8x1xf32>
      %79 = arith.mulf %78, %74 : vector<8x1xf32>
      %80 = vector.broadcast %79 : vector<8x1xf32> to vector<8x768xf32>
      %81 = arith.addf %76, %80 : vector<8x768xf32>
      %cst_49 = arith.constant 0.000000e+00 : f32
      %cst_50 = arith.constant 1.000000e+00 : f32
      %82 = vector.broadcast %cst_49 : f32 to vector<8x768xf32>
      %83 = arith.maximumf %82, %81 : vector<8x768xf32>
      %84 = vector.broadcast %cst_50 : f32 to vector<8x768xf32>
      %85 = arith.minimumf %84, %83 : vector<8x768xf32>
      %c0_51 = arith.constant 0 : index
      %c0_52 = arith.constant 0 : index
      %86 = vector.load %arg10[%c0_51, %c0_52] : memref<8x768xf32, #tpu.memory_space<vmem>>, vector<8x768xf32>
      tpu.vector_store %arg10[%c0_51, %c0_52], %85 {strides = array<i32>} : memref<8x768xf32, #tpu.memory_space<vmem>>, vector<8x768xf32>,
    } else {
    }
    %c1_26 = arith.constant 1 : index
    %38 = memref.load %arg1[%c1_26] : memref<3xf32, #tpu.memory_space<smem>>
    %c0_27 = arith.constant 0 : index
    %c0_28 = arith.constant 0 : index
    %39 = vector.load %arg10[%c0_27, %c0_28] : memref<8x768xf32, #tpu.memory_space<vmem>>, vector<8x768xf32>
    %40 = vector.broadcast %38 : f32 to vector<8x768xf32>
    %41 = arith.mulf %40, %39 : vector<8x768xf32>
    %42 = arith.addf %25, %41 : vector<8x768xf32>
    %c2_29 = arith.constant 2 : index
    %43 = memref.load %arg3[%c2_29] : memref<3xi32, #tpu.memory_space<smem>>
    %c0_i32_30 = arith.constant 0 : i32
    %44 = arith.cmpi sgt, %43, %c0_i32_30 : i32
    %45 = arith.select %44, %1, %0 : vector<8x768xf32>
    %c0_31 = arith.constant 0 : index
    %c0_32 = arith.constant 0 : index
    %46 = vector.load %arg10[%c0_31, %c0_32] : memref<8x768xf32, #tpu.memory_space<vmem>>, vector<8x768xf32>
    tpu.vector_store %arg10[%c0_31, %c0_32], %45 {strides = array<i32>} : memref<8x768xf32, #tpu.memory_space<vmem>>, vector<8x768xf32>,
    %c4 = arith.constant 4 : index
    %47 = memref.load %arg4[%c4] : memref<6xi32, #tpu.memory_space<smem>>
    %c0_i32_33 = arith.constant 0 : i32
    %48 = arith.cmpi ne, %47, %c0_i32_33 : i32
    %49 = arith.extui %48 : i1 to i32
    %c0_i32_34 = arith.constant 0 : i32
    %50 = arith.cmpi ne, %49, %c0_i32_34 : i32
    scf.if %50 {
      %c4_42 = arith.constant 4 : index
      %66 = memref.load %arg5[%c4_42] : memref<6xf32, #tpu.memory_space<smem>>
      %c4_43 = arith.constant 4 : index
      %67 = memref.load %arg6[%c4_43] : memref<6xf32, #tpu.memory_space<smem>>
      %c0_44 = arith.constant 0 : index
      %c0_45 = arith.constant 0 : index
      %68 = vector.load %arg10[%c0_44, %c0_45] : memref<8x768xf32, #tpu.memory_space<vmem>>, vector<8x768xf32>
      %69 = vector.broadcast %66 : f32 to vector<8x768xf32>
      %70 = arith.mulf %68, %69 : vector<8x768xf32>
      %71 = vector.broadcast %66 : f32 to vector<8x1xf32>
      %72 = arith.mulf %71, %5 : vector<8x1xf32>
      %73 = vector.broadcast %67 : f32 to vector<8x768xf32>
      %74 = arith.mulf %73, %70 : vector<8x768xf32>
      %cst_46 = arith.constant 1.000000e+00 : f32
      %75 = arith.subf %cst_46, %67 : f32
      %76 = vector.broadcast %75 : f32 to vector<8x1xf32>
      %77 = arith.mulf %76, %72 : vector<8x1xf32>
      %78 = vector.broadcast %77 : vector<8x1xf32> to vector<8x768xf32>
      %79 = arith.addf %74, %78 : vector<8x768xf32>
      %cst_47 = arith.constant 0.000000e+00 : f32
      %cst_48 = arith.constant 1.000000e+00 : f32
      %80 = vector.broadcast %cst_47 : f32 to vector<8x768xf32>
      %81 = arith.maximumf %80, %79 : vector<8x768xf32>
      %82 = vector.broadcast %cst_48 : f32 to vector<8x768xf32>
      %83 = arith.minimumf %82, %81 : vector<8x768xf32>
      %c0_49 = arith.constant 0 : index
      %c0_50 = arith.constant 0 : index
      %84 = vector.load %arg10[%c0_49, %c0_50] : memref<8x768xf32, #tpu.memory_space<vmem>>, vector<8x768xf32>
      tpu.vector_store %arg10[%c0_49, %c0_50], %83 {strides = array<i32>} : memref<8x768xf32, #tpu.memory_space<vmem>>, vector<8x768xf32>,
    } else {
    }
    %c5 = arith.constant 5 : index
    %51 = memref.load %arg4[%c5] : memref<6xi32, #tpu.memory_space<smem>>
    %c0_i32_35 = arith.constant 0 : i32
    %52 = arith.cmpi ne, %51, %c0_i32_35 : i32
    %53 = arith.extui %52 : i1 to i32
    %c0_i32_36 = arith.constant 0 : i32
    %54 = arith.cmpi ne, %53, %c0_i32_36 : i32
    scf.if %54 {
      %c5_42 = arith.constant 5 : index
      %66 = memref.load %arg5[%c5_42] : memref<6xf32, #tpu.memory_space<smem>>
      %c5_43 = arith.constant 5 : index
      %67 = memref.load %arg6[%c5_43] : memref<6xf32, #tpu.memory_space<smem>>
      %c0_44 = arith.constant 0 : index
      %c0_45 = arith.constant 0 : index
      %68 = vector.load %arg10[%c0_44, %c0_45] : memref<8x768xf32, #tpu.memory_space<vmem>>, vector<8x768xf32>
      %69 = vector.broadcast %66 : f32 to vector<8x768xf32>
      %70 = arith.mulf %68, %69 : vector<8x768xf32>
      %cst_46 = arith.constant dense<0.000000e+00> : vector<8xf32>
      %71 = vector.multi_reduction <add>, %70, %cst_46 [1] : vector<8x768xf32> to vector<8xf32>
      %72 = vector.shape_cast %71 : vector<8xf32> to vector<8x1xf32>
      %cst_47 = arith.constant 7.680000e+02 : f32
      %73 = vector.broadcast %cst_47 : f32 to vector<8x1xf32>
      %74 = arith.divf %72, %73 : vector<8x1xf32>
      %75 = vector.broadcast %67 : f32 to vector<8x768xf32>
      %76 = arith.mulf %75, %70 : vector<8x768xf32>
      %cst_48 = arith.constant 1.000000e+00 : f32
      %77 = arith.subf %cst_48, %67 : f32
      %78 = vector.broadcast %77 : f32 to vector<8x1xf32>
      %79 = arith.mulf %78, %74 : vector<8x1xf32>
      %80 = vector.broadcast %79 : vector<8x1xf32> to vector<8x768xf32>
      %81 = arith.addf %76, %80 : vector<8x768xf32>
      %cst_49 = arith.constant 0.000000e+00 : f32
      %cst_50 = arith.constant 1.000000e+00 : f32
      %82 = vector.broadcast %cst_49 : f32 to vector<8x768xf32>
      %83 = arith.maximumf %82, %81 : vector<8x768xf32>
      %84 = vector.broadcast %cst_50 : f32 to vector<8x768xf32>
      %85 = arith.minimumf %84, %83 : vector<8x768xf32>
      %c0_51 = arith.constant 0 : index
      %c0_52 = arith.constant 0 : index
      %86 = vector.load %arg10[%c0_51, %c0_52] : memref<8x768xf32, #tpu.memory_space<vmem>>, vector<8x768xf32>
      tpu.vector_store %arg10[%c0_51, %c0_52], %85 {strides = array<i32>} : memref<8x768xf32, #tpu.memory_space<vmem>>, vector<8x768xf32>,
    } else {
    }
    %c2_37 = arith.constant 2 : index
    %55 = memref.load %arg1[%c2_37] : memref<3xf32, #tpu.memory_space<smem>>
    %c0_38 = arith.constant 0 : index
    %c0_39 = arith.constant 0 : index
    %56 = vector.load %arg10[%c0_38, %c0_39] : memref<8x768xf32, #tpu.memory_space<vmem>>, vector<8x768xf32>
    %57 = vector.broadcast %55 : f32 to vector<8x768xf32>
    %58 = arith.mulf %57, %56 : vector<8x768xf32>
    %59 = arith.addf %42, %58 : vector<8x768xf32>
    %60 = vector.broadcast %7 : f32 to vector<8x768xf32>
    %61 = arith.mulf %60, %0 : vector<8x768xf32>
    %62 = vector.broadcast %6 : f32 to vector<8x768xf32>
    %63 = arith.mulf %62, %59 : vector<8x768xf32>
    %64 = arith.addf %61, %63 : vector<8x768xf32>
    %c0_40 = arith.constant 0 : index
    %c0_41 = arith.constant 0 : index
    %65 = vector.load %arg9[%c0_40, %c0_41] : memref<8x768xf32, #tpu.memory_space<vmem>>, vector<8x768xf32>
    tpu.vector_store %arg9[%c0_40, %c0_41], %64 {strides = array<i32>} : memref<8x768xf32, #tpu.memory_space<vmem>>, vector<8x768xf32>,
    return
  }
  func.func @transform_0(%arg0: i32) -> i32 {
    %c0_i32 = arith.constant 0 : i32
    %c0_i32_0 = arith.constant 0 : i32
    return %c0_i32 : i32
  }
  func.func @transform_1(%arg0: i32) -> i32 {
    %c0_i32 = arith.constant 0 : i32
    %c0_i32_0 = arith.constant 0 : i32
    return %c0_i32 : i32
  }
  func.func @transform_2(%arg0: i32) -> i32 {
    %c0_i32 = arith.constant 0 : i32
    %c0_i32_0 = arith.constant 0 : i32
    return %c0_i32 : i32
  }
  func.func @transform_3(%arg0: i32) -> i32 {
    %c0_i32 = arith.constant 0 : i32
    %c0_i32_0 = arith.constant 0 : i32
    return %c0_i32 : i32
  }
  func.func @transform_4(%arg0: i32) -> i32 {
    %c0_i32 = arith.constant 0 : i32
    %c0_i32_0 = arith.constant 0 : i32
    return %c0_i32 : i32
  }
  func.func @transform_5(%arg0: i32) -> i32 {
    %c0_i32 = arith.constant 0 : i32
    %c0_i32_0 = arith.constant 0 : i32
    return %c0_i32 : i32
  }
  func.func @transform_6(%arg0: i32) -> (i32, i32) {
    %c0_i32 = arith.constant 0 : i32
    %c0_i32_0 = arith.constant 0 : i32
    return %arg0, %c0_i32 : i32, i32
  }
  func.func @transform_7(%arg0: i32) -> (i32, i32) {
    %c0_i32 = arith.constant 0 : i32
    %c0_i32_0 = arith.constant 0 : i32
    return %arg0, %c0_i32 : i32, i32
  }
  func.func @transform_8(%arg0: i32) -> (i32, i32) {
    %c0_i32 = arith.constant 0 : i32
    %c0_i32_0 = arith.constant 0 : i32
    return %arg0, %c0_i32 : i32, i32
  }
}

</mosaic_0001>

<bundles_post_ra>
// kernel: tpu_custom_call.1
= control target key start
LH: loop header
LB: loop body
LE: loop exit
PB: predicated region body
PF: predicated region fallthrough
CT: control target
= control target key end

     0   :  { %s1936_s0 = inlined_call_operand.vmem [shape: f32[3], index: 0, kind: input, shape index: {}]   ;;  %s1937_s1 = inlined_call_operand.<no memory space> [shape: f32[1], index: 1, kind: input, shape index: {}]   ;;  %s1938_s2 = inlined_call_operand.vmem [shape: s32[3], index: 2, kind: input, shape index: {}]   ;;  %s1939_s3 = inlined_call_operand.vmem [shape: s32[6], index: 3, kind: input, shape index: {}]   ;;  %s1940_s4 = inlined_call_operand.vmem [shape: f32[6], index: 4, kind: input, shape index: {}]   ;;  %s1941_s5 = inlined_call_operand.vmem [shape: f32[6], index: 5, kind: input, shape index: {}]   ;;  %s1942_s6 = inlined_call_operand.hbm [shape: f32[16,768], index: 6, kind: input, shape index: {}]   ;;  %s1943_s7 = inlined_call_operand.hbm [shape: f32[16,768], index: 7, kind: input, shape index: {}]   ;;  %s1944_s8 = inlined_call_operand.hbm [shape: f32[16,768], index: 8, kind: output, shape index: {}]  }
   0x1   :  { %1950 = sst [smem:[#allocation24_spill]] %s1936_s0 }
   0x2   :  { %1951 = sst [smem:[#allocation25_spill]] %s1938_s2 }
   0x3   :  { %13 = sst [smem:[#allocation3]] %s1937_s1 }
   0x4   :  { %14 = vsyncpa [#allocation7], 0 }
   0x5   :  { %15 = vsyncpa [#allocation9], 0 }
   0x6   :  { %16 = vsyncpa [#allocation12], 0 }
   0x7   :  { %17 = vsyncpa [#allocation5], 0 }
   0x8   :  { %19 = vsyncpa [#allocation5 + $0x1], 0 }
   0x9   :  { %20 = vsyncpa [#allocation16], 0 }
   0xa   :  { %22 = vsyncpa [#allocation16 + $0x1], 0 }
   0xb   :  { %23 = vsyncpa [#allocation6], 0 }
   0xc   :  { %25 = vsyncpa [#allocation6 + $0x1], 0  ;;  %s1521_s29 = smov 0   ;;  %s1523_s30 = smov 0  }
   0xd   :  { %s1525_s9 = smov 0   ;;  %s1527_s10 = smov 0  }
   0xe LB: > { %s1952_s2 = sld [smem:[#allocation25_spill]]  ;;  %s1545_s13 = sadd.s32 4294967295, %s1463_s10   ;;  %s1463_s10 = sphi %s1527_s10, %s1977_s10   ;;  %s1459_s9 = sphi %s1525_s9, %s1976_s9   ;;  %s1455_s30 = sphi %s1523_s30, %s1975_s30   ;;  %s1451_s29 = sphi %s1521_s29, %s1974_s29  }
   0xf   : > { %p1095_p0 = scmp.ge.s32.totalorder %s1463_s10, 1  ;;  %p1945_p1 = scmp.eq.s32.totalorder %s1545_s13, 0 }
  0x10   : > { %p240_p2 = scmp.lt.s32.totalorder %s1463_s10, 3  ;;  %s289_s17 = sshll.u32 %s1940_s4, 4  ;;  %s290_s17 = int_to_ptr.vmem [resolvable:$true] %s289_s17 }
  0x11   : > { %s1954_s0 = sld [smem:[#allocation24_spill]]  ;;  %s278_s24 = sshll.u32 %s1939_s3, 4  ;;  %s1574_s24 = int_to_ptr.vmem [resolvable:$true] %s278_s24 }
  0x12   : > { %p1550_p3 = pnand %p1095_p0, %p240_p2 }
  0x14   : > { %s267_s12 = sshll.u32 %s1952_s2, 4  ;;  %p1170_p5 = pneg %p1550_p3  ;;  %s268_s12 = int_to_ptr.vmem [resolvable:$true] %s267_s12 }
  0x15   : > { %s1953_s14 = scalar_select %p1550_p3, 1, 0 }
  0x16   : > { %p1565_p6 = pnand %p1170_p5, %p1945_p1  ;;  %s1246_s25 = scalar_lea.vmem %s268_s12, 16 }
  0x17   : > { %s253_s20 = sshll.u32 %s1954_s0, 4  ;;  %p1247_p7 = scmp.ne.s32.totalorder %s268_s12, %s1246_s25  ;;  %s1569_s20 = int_to_ptr.vmem [resolvable:$true] %s253_s20 }
  0x18   : > { %p1578_p8 = pneg %p1565_p6  ;;  %p1254_p11 = scmp.lt.s32.totalorder %s268_s12, %s268_s12 }
  0x19   : > { %p1255_p12 = scmp.lt.s32.totalorder %s1246_s25, %s1246_s25 }
  0x1a   : > { %p1249_p9 = pnand %p1578_p8, %p1247_p7 }
  0x1b   : > { %p1256_p13 = por %p1255_p12, %p1254_p11 }
  0x1c   : > { %p1250_p10 = pneg %p1249_p9 }
  0x1e   : > { %p1257_p0 = pnand %p1256_p13, %p1250_p10 }
  0x20   : > { %1260 = shalt.err (!%p1257_p0)
}
  0x21   : > { %s1465_s27 = smov [#allocation8]   ;;  %s1261_s28 = scalar_lea.vmem %s290_s17, 16 }
  0x22   : > { %1176 = dma.vmem_to_smem (!%p1565_p6), %s268_s12, 16, %s1465_s27, [#allocation9]  }
  0x23   : > { %p1262_p2 = scmp.ne.s32.totalorder %s290_s17, %s1261_s28  ;;  %p1269_p1 = scmp.lt.s32.totalorder %s290_s17, %s290_s17 }
  0x24   : > { %p1270_p3 = scmp.lt.s32.totalorder %s1261_s28, %s1261_s28 }
  0x25   : > { %p1264_p5 = pnand %p1262_p2, %p1578_p8 }
  0x26   : > { %p1271_p7 = por %p1270_p3, %p1269_p1 }
  0x27   : > { %p1265_p4 = pneg %p1264_p5 }
  0x29   : > { %p1272_p9 = pnand %p1271_p7, %p1265_p4 }
  0x2b   : > { %1275 = shalt.err (!%p1272_p9)
}
  0x2c   : > { %s1466_s1 = smov [#allocation11]   ;;  %s1276_s11 = scalar_lea.vmem %s1569_s20, 16 }
  0x2d   : > { %1182 = dma.vmem_to_smem (!%p1565_p6), %s290_s17, 16, %s1466_s1, [#allocation12]  }
  0x2e   : > { %p1277_p10 = scmp.ne.s32.totalorder %s1569_s20, %s1276_s11  ;;  %p1284_p13 = scmp.lt.s32.totalorder %s1569_s20, %s1569_s20 }
  0x2f   : > { %p1285_p0 = scmp.lt.s32.totalorder %s1276_s11, %s1276_s11 }
  0x30   : > { %p1279_p11 = pnand %p1277_p10, %p1578_p8 }
  0x31   : > { %p1286_p2 = por %p1285_p0, %p1284_p13 }
  0x32   : > { %p1280_p12 = pneg %p1279_p11 }
  0x34   : > { %p1287_p1 = pnand %p1286_p2, %p1280_p12 }
  0x36   : > { %1290 = shalt.err (!%p1287_p1)
}
  0x37   : > { %s1467_s12 = smov [#allocation4]   ;;  %s1291_s15 = scalar_lea.vmem %s1574_s24, 16 }
  0x38   : > { %1173 = dma.vmem_to_smem (!%p1565_p6), %s1569_s20, 16, %s1467_s12, [#allocation7]  }
  0x39   : > { %p1292_p3 = scmp.ne.s32.totalorder %s1574_s24, %s1291_s15  ;;  %p1299_p7 = scmp.lt.s32.totalorder %s1574_s24, %s1574_s24 }
  0x3a   : > { %p1300_p9 = scmp.lt.s32.totalorder %s1291_s15, %s1291_s15 }
  0x3b   : > { %p1294_p4 = pnand %p1292_p3, %p1578_p8 }
  0x3c   : > { %p1301_p10 = por %p1300_p9, %p1299_p7 }
  0x3d   : > { %p1295_p5 = pneg %p1294_p4 }
  0x3f   : > { %p1302_p11 = pnand %p1301_p10, %p1295_p5 }
  0x41   : > { %1305 = shalt.err (!%p1302_p11)
}
  0x42   : > { %s1468_s16 = smov [#allocation10]   ;;  %s300_s19 = sshll.u32 %s1941_s5, 4  ;;  %s301_s19 = int_to_ptr.vmem [resolvable:$true] %s300_s19 }
  0x43   : > { %1179 = dma.vmem_to_smem (!%p1565_p6), %s1574_s24, 16, %s1468_s16, [#allocation9]  }
  0x44   : > { %s1306_s20 = scalar_lea.vmem %s301_s19, 16  ;;  %p1314_p2 = scmp.lt.s32.totalorder %s301_s19, %s301_s19 }
  0x45   : > { %p1307_p12 = scmp.ne.s32.totalorder %s301_s19, %s1306_s20  ;;  %p1315_p1 = scmp.lt.s32.totalorder %s1306_s20, %s1306_s20 }
  0x47   : > { %p1309_p13 = pnand %p1307_p12, %p1578_p8  ;;  %p1316_p3 = por %p1315_p1, %p1314_p2 }
  0x49   : > { %p1310_p0 = pneg %p1309_p13 }
  0x4b   : > { %p1317_p4 = pnand %p1316_p3, %p1310_p0 }
  0x4d   : > { %1320 = shalt.err (!%p1317_p4)
}
  0x4e   : > { %s1469_s22 = smov [#allocation13]   ;;  %s1094_s23 = sadd.s32 4294967294, %s1463_s10  }
  0x4f   : > { %1185 = dma.vmem_to_smem (!%p1565_p6), %s301_s19, 16, %s1469_s22, [#allocation12]  }
  0x50   : > { %s1617_s24 = sadd.s32 1, %s1463_s10   ;;  %s164_s21 = sadd.s32 1, %s1459_s9 }
  0x51   : > { %s161_s25 = ssub.s32 %s1463_s10, %s1617_s24  ;;  %p171_p8 = scmp.ne.s32.totalorder %s1459_s9, %s1455_s30 }
  0x52   : > { %p162_p5 = scmp.eq.s32.totalorder %s161_s25, 0  ;;  %p172_p7 = scmp.eq.s32.totalorder %s1463_s10, 0 }
  0x53   : > { %p177_p9 = scmp.ne.s32.totalorder %s1455_s30, %s1451_s29  ;;  %p227_p10 = scmp.eq.s32.totalorder %s1545_s13, 1 }
  0x54   : > { %s1629_s26 = scalar_select %p162_p5, %s1459_s9, %s164_s21  }
  0x55   : > { %p173_p11 = por %p172_p7, %p171_p8  ;;  %p1957_p12 = scmp.eq.s32.totalorder %s1545_s13, 0 }
  0x56   : > { %p1637_p6 = por %p227_p10, %p171_p8  ;;  %p233_p0 = scmp.eq.s32.totalorder %s1094_s23, 1 }
  0x57   : > { %p1633_p13 = por %p1957_p12, %p177_p9  ;;  %p1202_p2 = scmp.lt.s32.totalorder %s1463_s10, 2 }
  0x58   : > { %s1959_s28 = scalar_select %p1637_p6, 1, 0 }
  0x59   : > { %s1958_s27 = scalar_select %p1633_p13, 1, 0 }
  0x5a   : > { %s1643_s1 = sand.u32 1, %s1459_s9   ;;  %p1645_p1 = por %p233_p0, %p177_p9 }
  0x5b   : > { %s1138_s12 = smul.u32 48, %s1643_s1  ;;  %p1650_p3 = pnand %p1202_p2, %p173_p11 }
  0x5c   : > { %s1960_s11 = scalar_select %p1645_p1, 1, 0 }
  0x5d   : > { %s1947_s16 = smul.u32 768, %s1463_s10  ;;  %s315_s20 = scalar_lea.vmem [#allocation14], %s1138_s12 }
  0x5e   : > { %s323_s22 = sshll.u32 %s315_s20, 4  ;;  %s312_s23 = scalar_lea.sflag [#allocation5], %s1643_s1  ;;  %s1664_s22 = int_to_ptr.vmem [resolvable:$true] %s323_s22 }
  0x5f   : > { %s1660_s19 = scalar_lea.hbm %s1942_s6, %s1947_s16  ;;  %p1323_p8 = pneg %p1650_p3 }
  0x60   : > { %s1321_s21 = scalar_lea.hbm %s1660_s19, 768  ;;  %s1326_s18 = scalar_lea.hbm %s1942_s6, 1536 }
  0x61   : > { %p1322_p4 = scmp.ne.s32.totalorder %s1660_s19, %s1321_s21  ;;  %p1327_p9 = scmp.lt.u32.totalorder %s1660_s19, %s1942_s6 }
  0x62   : > { %p1328_p10 = scmp.lt.u32.totalorder %s1326_s18, %s1321_s21  ;;  %p1330_p12 = scmp.lt.u32.totalorder %s1321_s21, %s1660_s19 }
  0x63   : > { %p1324_p5 = pnand %p1323_p8, %p1322_p4 }
  0x64   : > { %p1329_p11 = por %p1328_p10, %p1327_p9 }
  0x65   : > { %p1325_p7 = pneg %p1324_p5 }
  0x66   : > { %p1331_p0 = por %p1330_p12, %p1329_p11 }
  0x68   : > { %p1332_p2 = pnand %p1331_p0, %p1325_p7 }
  0x6a   : > { %1335 = shalt.err (!%p1332_p2)
}
  0x6b   : > { %s1336_s20 = scalar_lea.vmem %s1664_s22, 768  ;;  %s1470_s25 = smov [#allocation14]  }
  0x6c   : > { %p1337_p4 = scmp.ne.s32.totalorder %s1664_s22, %s1336_s20  ;;  %s1341_s17 = sshll.u32 %s1470_s25, 4  ;;  %s1342_s17 = int_to_ptr.vmem [resolvable:$false] %s1341_s17 }
  0x6d   : > { %s1343_s0 = scalar_lea.vmem %s1342_s17, 1536  ;;  %p1344_p6 = scmp.lt.s32.totalorder %s1664_s22, %s1342_s17 }
  0x6e   : > { %p1339_p5 = pnand %p1337_p4, %p1323_p8  ;;  %p1345_p9 = scmp.lt.s32.totalorder %s1343_s0, %s1336_s20 }
  0x70   : > { %p1340_p1 = pneg %p1339_p5  ;;  %p1346_p10 = por %p1345_p9, %p1344_p6 }
  0x72   : > { %p1347_p11 = pnand %p1346_p10, %p1340_p1 }
  0x74   : > { %1350 = shalt.err (!%p1347_p11)
}
  0x75   : > { %1189 = dma.hbm_to_vmem [thread:$0]  (!%p1650_p3), %s1660_s19, 768, %s1664_s22, %s312_s23  }
  0x76   : > { %s1962_s16 = smul.u32 768, %s1463_s10  ;;  %s334_s20 = scalar_lea.vmem [#allocation15], %s1138_s12 }
  0x77   : > { %s342_s17 = sshll.u32 %s334_s20, 4  ;;  %s331_s0 = scalar_lea.sflag [#allocation16], %s1643_s1  ;;  %s343_s17 = int_to_ptr.vmem [resolvable:$true] %s342_s17 }
  0x78   : > { %s1697_s25 = scalar_lea.hbm %s1943_s7, %s1962_s16  ;;  %s1356_s23 = scalar_lea.hbm %s1943_s7, 1536 }
  0x79   : > { %s1351_s2 = scalar_lea.hbm %s1697_s25, 768  ;;  %p1357_p12 = scmp.lt.u32.totalorder %s1697_s25, %s1943_s7 }
  0x7a   : > { %p1352_p6 = scmp.ne.s32.totalorder %s1697_s25, %s1351_s2  ;;  %p1358_p0 = scmp.lt.u32.totalorder %s1356_s23, %s1351_s2 }
  0x7b   : > { %p1360_p4 = scmp.lt.u32.totalorder %s1351_s2, %s1697_s25 }
  0x7c   : > { %p1354_p1 = pnand %p1352_p6, %p1323_p8  ;;  %p1359_p2 = por %p1358_p0, %p1357_p12 }
  0x7e   : > { %p1355_p7 = pneg %p1354_p1  ;;  %p1361_p5 = por %p1360_p4, %p1359_p2 }
  0x80   : > { %p1362_p9 = pnand %p1361_p5, %p1355_p7 }
  0x82   : > { %1365 = shalt.err (!%p1362_p9)
}
  0x83   : > { %s1366_s1 = scalar_lea.vmem %s343_s17, 768  ;;  %s1471_s12 = smov [#allocation15]  }
  0x84   : > { %p1367_p10 = scmp.ne.s32.totalorder %s343_s17, %s1366_s1  ;;  %s1371_s18 = sshll.u32 %s1471_s12, 4  ;;  %s1372_s18 = int_to_ptr.vmem [resolvable:$false] %s1371_s18 }
  0x85   : > { %s1373_s20 = scalar_lea.vmem %s1372_s18, 1536  ;;  %p1374_p1 = scmp.lt.s32.totalorder %s343_s17, %s1372_s18 }
  0x86   : > { %p1369_p11 = pnand %p1367_p10, %p1323_p8  ;;  %p1375_p13 = scmp.lt.s32.totalorder %s1373_s20, %s1366_s1 }
  0x88   : > { %p1370_p6 = pneg %p1369_p11  ;;  %p1376_p0 = por %p1375_p13, %p1374_p1 }
  0x8a   : > { %p1377_p12 = pnand %p1376_p0, %p1370_p6 }
  0x8c   : > { %1380 = shalt.err (!%p1377_p12)
}
  0x8d   : > { %1192 = dma.hbm_to_vmem [thread:$0]  (!%p1650_p3), %s1697_s25, 768, %s343_s17, %s331_s0  }
  0x8e   : > { %p1963_p7 = scmp.ne.s32.totalorder %s1953_s14, 0 }
  0x8f   : > { %p1964_p2 = scmp.eq.s32.totalorder (!%p1963_p7), %s1545_s13, 0 }
  0x90   : > { %351 = sbr.rel (%p1963_p7) target bundleno = 977 (0x3d1), region = 52 }
  0x97   : > { %1426 = dma.done.wait (%p1964_p2), [#allocation7], 16   ;;  %p1965_p8 = pmov %p1964_p2 }
  0x98   : > { %p1966_p4 = pmov %p1964_p2 }
  0x99   : > { %1428 = vsyncadd (%p1965_p8), [#allocation7], 4294967280 }
  0x9a   : > { %1430 = dma.done.wait (%p1966_p4), [#allocation9], 32   ;;  %p1967_p13 = pmov %p1964_p2 }
  0x9b   : > { %p1968_p5 = pmov %p1964_p2 }
  0x9c   : > { %1432 = vsyncadd (%p1967_p13), [#allocation9], 4294967264 }
  0x9d   : > { %1434 = dma.done.wait (%p1968_p5), [#allocation12], 32   ;;  %p1969_p3 = pmov %p1964_p2 }
  0x9e   : > { %s1736_s2 = sand.u32 1, %s1455_s30   ;;  %p1970_p9 = scmp.ne.s32.totalorder %s1958_s27, 0 }
  0x9f   : > { %1436 = vsyncadd (%p1969_p3), [#allocation12], 4294967264  ;;  %s1739_s14 = smul.u32 48, %s1736_s2  ;;  %s374_s15 = scalar_lea.sflag [#allocation5], %s1736_s2 }
  0xa1   : > { %s377_s25 = scalar_lea.vmem [#allocation14], %s1739_s14 }
  0xa2   : > { %1438 = dma.done.wait (%p1970_p9), %s374_s15, 768  }
  0xa3   : > { %1440 = vsyncadd (%p1970_p9), %s374_s15, 4294966528  ;;  %s383_s17 = scalar_lea.sflag [#allocation16], %s1736_s2  ;;  %s386_s0 = scalar_lea.vmem [#allocation15], %s1739_s14 }
  0xa4   : > { %1442 = dma.done.wait (%p1970_p9), %s383_s17, 768  }
  0xa5   : > { %1444 = vsyncadd (%p1970_p9), %s383_s17, 4294966528 }
  0xa6   : > { %391 = sfence }
  0xa7   : > { %v1753_v0 = vld [vmem:[%s377_s25] sm:$0xff]  ;;  %v1755_v1 = vld [vmem:[%s377_s25 + $0x8] sm:$0xff]  ;;  %v1757_v2 = vld [vmem:[%s377_s25 + $0x10] sm:$0xff]  ;;  %s448_s19 = sld [smem:[#allocation8]]  ;;  %s1795_s22 = sld [smem:[#allocation3]] }
  0xa8   : > { %v437_v3 = vadd.f32 %v1755_v1, %v1753_v0  ;;  %v1761_v4 = vld [vmem:[%s377_s25 + $0x18] sm:$0xff]  ;;  %v1764_v6 = vld [vmem:[%s377_s25 + $0x20] sm:$0xff]  ;;  %v1767_v8 = vld [vmem:[%s377_s25 + $0x28] sm:$0xff]  ;;  %s465_s16 = sld [smem:[#allocation10]]  ;;  %s1801_s21 = scalar_lea.vmem [#allocation17], %s1739_s14 }
  0xa9   : > { %v1770_v10 = vld [vmem:[%s386_s0] sm:$0xff]  ;;  %v1772_v11 = vld [vmem:[%s386_s0 + $0x8] sm:$0xff]  ;;  %v1774_v12 = vld [vmem:[%s386_s0 + $0x10] sm:$0xff] }
  0xaa   : > { %v438_v5 = vadd.f32 %v437_v3, %v1757_v2  ;;  %v1776_v13 = vld [vmem:[%s386_s0 + $0x18] sm:$0xff]  ;;  %v1779_v15 = vld [vmem:[%s386_s0 + $0x20] sm:$0xff]  ;;  %v1781_v16 = vld [vmem:[%s386_s0 + $0x28] sm:$0xff] }
  0xac   : > { %v439_v7 = vadd.f32 %v438_v5, %v1761_v4 }
  0xad   : > { %p449_p10 = scmp.gt.s32.totalorder %s448_s19, 0  ;;  %s447_s23 = ssub.f32 1.0, %s1795_s22 }
  0xae   : > { %v440_v9 = vadd.f32 %v439_v7, %v1764_v6  ;;  %p1110_p11 = scmp.eq.s32.totalorder %s465_s16, 0 }
  0xaf   : > { %s450_s27 = scalar_select %p449_p10, 1, 0 }
  0xb0   : > { %v441_v14 = vadd.f32 %v440_v9, %v1767_v8  ;;  %s470_s1 = sld [smem:[#allocation11]] (!%p1110_p11) }
  0xb1   : > { %v451_v17 = vstv %s450_s27  ;;  %s471_s12 = sld [smem:[#allocation13]] (!%p1110_p11) }
  0xb2   : > { %442 = vadd.xlane.f32.xlu0 %v441_v14  ;;  %vm452_vm0 = vcmp.eq.s32.totalorder %v451_v17, 1 }
  0xb3   : > { %v453_v18 = vsel %vm452_vm0, %v1770_v10, %v1753_v0  ;;  %v454_v19 = vsel %vm452_vm0, %v1772_v11, %v1755_v1  ;;  %v455_v20 = vsel %vm452_vm0, %v1774_v12, %v1757_v2  ;;  %v456_v21 = vsel %vm452_vm0, %v1776_v13, %v1761_v4 }
  0xb4   : > { %v457_v22 = vsel %vm452_vm0, %v1779_v15, %v1764_v6  ;;  %v458_v23 = vsel %vm452_vm0, %v1781_v16, %v1767_v8  ;;  %459 = vst [vmem:[#allocation2] sm:$0xff] %v453_v18  ;;  %460 = vst [vmem:[#allocation2 + $0x8] sm:$0xff] %v454_v19 }
  0xb5   : > { %461 = vst [vmem:[#allocation2 + $0x10] sm:$0xff] %v455_v20  ;;  %462 = vst [vmem:[#allocation2 + $0x18] sm:$0xff] %v456_v21 }
  0xb6   : > { %463 = vst [vmem:[#allocation2 + $0x20] sm:$0xff] %v457_v22  ;;  %464 = vst [vmem:[#allocation2 + $0x28] sm:$0xff] %v458_v23  ;;  %v478_v32 = vstv (!%p1110_p11), %s470_s1 }
  0xb7   : > { %v486_v33 = vstv (!%p1110_p11), %s471_s12  ;;  %s493_s18 = ssub.f32 (!%p1110_p11), 1.0, %s471_s12 }
  0xb9   : > { %v494_v38 = vstv (!%p1110_p11), %s493_s18 }
  0xbb   : > { %v472_v26 = vld [vmem:[#allocation2] sm:$0xff] (!%p1110_p11)  ;;  %v473_v27 = vld [vmem:[#allocation2 + $0x8] sm:$0xff] (!%p1110_p11) }
  0xbc   : > { %v474_v28 = vld [vmem:[#allocation2 + $0x10] sm:$0xff] (!%p1110_p11)  ;;  %v475_v29 = vld [vmem:[#allocation2 + $0x18] sm:$0xff] (!%p1110_p11)  ;;  %v479_v34 = vmul.f32 (!%p1110_p11), %v478_v32, %v472_v26  ;;  %v480_v36 = vmul.f32 (!%p1110_p11), %v478_v32, %v473_v27 }
  0xbd   : > { %v476_v30 = vld [vmem:[#allocation2 + $0x20] sm:$0xff] (!%p1110_p11)  ;;  %v477_v31 = vld [vmem:[#allocation2 + $0x28] sm:$0xff] (!%p1110_p11)  ;;  %v481_v37 = vmul.f32 (!%p1110_p11), %v478_v32, %v474_v28  ;;  %v482_v39 = vmul.f32 (!%p1110_p11), %v478_v32, %v475_v29 }
  0xbe   : > { %v483_v40 = vmul.f32 (!%p1110_p11), %v478_v32, %v476_v30  ;;  %v484_v41 = vmul.f32 (!%p1110_p11), %v478_v32, %v477_v31  ;;  %v487_v42 = vmul.f32 (!%p1110_p11), %v486_v33, %v479_v34  ;;  %v488_v44 = vmul.f32 (!%p1110_p11), %v486_v33, %v480_v36 }
  0xbf   : > { %v489_v45 = vmul.f32 (!%p1110_p11), %v486_v33, %v481_v37  ;;  %v490_v46 = vmul.f32 (!%p1110_p11), %v486_v33, %v482_v39 }
  0xc0   : > { %v491_v47 = vmul.f32 (!%p1110_p11), %v486_v33, %v483_v40  ;;  %v492_v48 = vmul.f32 (!%p1110_p11), %v486_v33, %v484_v41 }
 0x13a   : > { %469 = sbr.rel (%p1110_p11) target bundleno = 335 (0x14f), region = 84 }
 0x13f   : > { %v443_v24 = vpop.xlane.xlu0 %442 }
 0x140   : > { %v1798_v25 = vmul.f32 0.0013020834, %v443_v24 }
 0x142   : > { %v485_v35 = vmul.f32 %v478_v32, %v1798_v25 }
 0x144   : > { %v495_v43 = vmul.f32 %v494_v38, %v485_v35 }
 0x146   : > { %v496_v49 = vadd.f32 %v495_v43, %v487_v42  ;;  %v497_v50 = vadd.f32 %v495_v43, %v488_v44  ;;  %v498_v51 = vadd.f32 %v495_v43, %v489_v45  ;;  %v499_v52 = vadd.f32 %v495_v43, %v490_v46 }
 0x147   : > { %v500_v53 = vadd.f32 %v495_v43, %v491_v47  ;;  %v501_v54 = vadd.f32 %v495_v43, %v492_v48 }
 0x148   : > { %v502_v55 = vmax.f32 %v496_v49, 0.0  ;;  %v503_v56 = vmax.f32 %v497_v50, 0.0  ;;  %v504_v57 = vmax.f32 %v498_v51, 0.0  ;;  %v505_v58 = vmax.f32 %v499_v52, 0.0 }
 0x149   : > { %v506_v59 = vmax.f32 %v500_v53, 0.0  ;;  %v507_v60 = vmax.f32 %v501_v54, 0.0 }
 0x14a   : > { %v508_v61 = vmin.f32 %v502_v55, 1.0  ;;  %v509_v62 = vmin.f32 %v503_v56, 1.0  ;;  %v510_v63 = vmin.f32 %v504_v57, 1.0  ;;  %v511_v3 = vmin.f32 %v505_v58, 1.0 }
 0x14b   : > { %v512_v5 = vmin.f32 %v506_v59, 1.0  ;;  %v513_v7 = vmin.f32 %v507_v60, 1.0 }
 0x14c   : > { %514 = vst [vmem:[#allocation2] sm:$0xff] %v508_v61  ;;  %515 = vst [vmem:[#allocation2 + $0x8] sm:$0xff] %v509_v62 }
 0x14d   : > { %516 = vst [vmem:[#allocation2 + $0x10] sm:$0xff] %v510_v63  ;;  %517 = vst [vmem:[#allocation2 + $0x18] sm:$0xff] %v511_v3 }
 0x14e   : > { %518 = vst [vmem:[#allocation2 + $0x20] sm:$0xff] %v512_v5  ;;  %519 = vst [vmem:[#allocation2 + $0x28] sm:$0xff] %v513_v7 }
 0x14f PF: > { %s1111_s20 = sld [smem:[#allocation10 + $0x1]] }
 0x155   : > { %p1112_p6 = scmp.eq.s32.totalorder %s1111_s20, 0 }
 0x156   : > { %s1113_s14 = sld [smem:[#allocation11 + $0x1]] (!%p1112_p6)  ;;  %v527_v9 = vld [vmem:[#allocation2] sm:$0xff] (!%p1112_p6)  ;;  %v528_v14 = vld [vmem:[#allocation2 + $0x8] sm:$0xff] (!%p1112_p6)  ;;  %v529_v17 = vld [vmem:[#allocation2 + $0x10] sm:$0xff] (!%p1112_p6) }
 0x157   : > { %524 = sbr.rel (%p1112_p6) target bundleno = 516 (0x204), region = 88  ;;  %v530_v18 = vld [vmem:[#allocation2 + $0x18] sm:$0xff] (!%p1112_p6)  ;;  %v531_v23 = vld [vmem:[#allocation2 + $0x20] sm:$0xff] (!%p1112_p6)  ;;  %v532_v27 = vld [vmem:[#allocation2 + $0x28] sm:$0xff] (!%p1112_p6)  ;;  %s1114_s15 = sld [smem:[#allocation13 + $0x1]] (!%p1112_p6) }
 0x15c   : > { %v533_v19 = vstv (!%p1112_p6), %s1113_s14 }
 0x15d   : > { %v534_v20 = vmul.f32 (!%p1112_p6), %v533_v19, %v527_v9  ;;  %v535_v21 = vmul.f32 (!%p1112_p6), %v533_v19, %v528_v14  ;;  %v536_v22 = vmul.f32 (!%p1112_p6), %v533_v19, %v529_v17  ;;  %v537_v24 = vmul.f32 (!%p1112_p6), %v533_v19, %v530_v18  ;;  %s555_s25 = ssub.f32 (!%p1112_p6), 1.0, %s1114_s15 }
 0x15e   : > { %v538_v28 = vmul.f32 %v533_v19, %v531_v23  ;;  %v539_v30 = vmul.f32 %v533_v19, %v532_v27  ;;  %v548_v34 = vstv %s1114_s15 }
 0x15f   : > { %v540_v26 = vadd.f32 %v535_v21, %v534_v20  ;;  %v549_v35 = vmul.f32 %v548_v34, %v534_v20  ;;  %v556_v37 = vstv %s555_s25  ;;  %v550_v38 = vmul.f32 %v548_v34, %v535_v21 }
 0x160   : > { %v551_v39 = vmul.f32 %v548_v34, %v536_v22  ;;  %v552_v40 = vmul.f32 %v548_v34, %v537_v24  ;;  %v553_v42 = vmul.f32 %v548_v34, %v538_v28  ;;  %v554_v43 = vmul.f32 %v548_v34, %v539_v30 }
 0x161   : > { %v541_v29 = vadd.f32 %v540_v26, %v536_v22 }
 0x163   : > { %v542_v31 = vadd.f32 %v541_v29, %v537_v24 }
 0x165   : > { %v543_v32 = vadd.f32 %v542_v31, %v538_v28 }
 0x167   : > { %v544_v33 = vadd.f32 %v543_v32, %v539_v30 }
 0x169   : > { %545 = vadd.xlane.f32.xlu0 %v544_v33 }
 0x1f6   : > { %v546_v36 = vpop.xlane.xlu0 %545 }
 0x1f7   : > { %v547_v41 = vmul.f32 0.0013020834, %v546_v36 }
 0x1f9   : > { %v557_v44 = vmul.f32 %v556_v37, %v547_v41 }
 0x1fb   : > { %v558_v45 = vadd.f32 %v557_v44, %v549_v35  ;;  %v559_v46 = vadd.f32 %v557_v44, %v550_v38  ;;  %v560_v47 = vadd.f32 %v557_v44, %v551_v39  ;;  %v561_v48 = vadd.f32 %v557_v44, %v552_v40 }
 0x1fc   : > { %v562_v49 = vadd.f32 %v557_v44, %v553_v42  ;;  %v563_v50 = vadd.f32 %v557_v44, %v554_v43 }
 0x1fd   : > { %v564_v51 = vmax.f32 %v558_v45, 0.0  ;;  %v565_v52 = vmax.f32 %v559_v46, 0.0  ;;  %v566_v53 = vmax.f32 %v560_v47, 0.0  ;;  %v567_v54 = vmax.f32 %v561_v48, 0.0 }
 0x1fe   : > { %v568_v55 = vmax.f32 %v562_v49, 0.0  ;;  %v569_v56 = vmax.f32 %v563_v50, 0.0 }
 0x1ff   : > { %v570_v57 = vmin.f32 %v564_v51, 1.0  ;;  %v571_v58 = vmin.f32 %v565_v52, 1.0  ;;  %v572_v59 = vmin.f32 %v566_v53, 1.0  ;;  %v573_v60 = vmin.f32 %v567_v54, 1.0 }
 0x200   : > { %v574_v61 = vmin.f32 %v568_v55, 1.0  ;;  %v575_v62 = vmin.f32 %v569_v56, 1.0 }
 0x201   : > { %576 = vst [vmem:[#allocation2] sm:$0xff] %v570_v57  ;;  %577 = vst [vmem:[#allocation2 + $0x8] sm:$0xff] %v571_v58 }
 0x202   : > { %578 = vst [vmem:[#allocation2 + $0x10] sm:$0xff] %v572_v59  ;;  %579 = vst [vmem:[#allocation2 + $0x18] sm:$0xff] %v573_v60 }
 0x203   : > { %580 = vst [vmem:[#allocation2 + $0x20] sm:$0xff] %v574_v61  ;;  %581 = vst [vmem:[#allocation2 + $0x28] sm:$0xff] %v575_v62 }
 0x204 PF: > { %s582_s17 = sld [smem:[#allocation4]]  ;;  %s1115_s0 = sld [smem:[#allocation8 + $0x1]] }
 0x205   : > { %s1804_s19 = sld [smem:[#allocation10 + $0x2]] }
 0x208   : > { %v583_v63 = vld [vmem:[#allocation2] sm:$0xff]  ;;  %v584_v3 = vld [vmem:[#allocation2 + $0x8] sm:$0xff] }
 0x209   : > { %v585_v5 = vld [vmem:[#allocation2 + $0x10] sm:$0xff]  ;;  %v586_v7 = vld [vmem:[#allocation2 + $0x18] sm:$0xff] }
 0x20a   : > { %v587_v9 = vld [vmem:[#allocation2 + $0x20] sm:$0xff]  ;;  %v588_v14 = vld [vmem:[#allocation2 + $0x28] sm:$0xff]  ;;  %v589_v17 = vstv %s582_s17  ;;  %p603_p1 = scmp.gt.s32.totalorder %s1115_s0, 0 }
 0x20b   : > { %v1806_v18 = vmul.f32 %v589_v17, %v583_v63  ;;  %v1808_v19 = vmul.f32 %v589_v17, %v584_v3  ;;  %v1810_v20 = vmul.f32 %v589_v17, %v585_v5  ;;  %v1812_v21 = vmul.f32 %v589_v17, %v586_v7  ;;  %p1117_p0 = scmp.eq.s32.totalorder %s1804_s19, 0 }
 0x20c   : > { %s604_s27 = scalar_select %p603_p1, 1, 0  ;;  %v1814_v22 = vmul.f32 %v589_v17, %v587_v9  ;;  %v1816_v23 = vmul.f32 %v589_v17, %v588_v14 }
 0x20d   : > { %623 = sbr.rel (%p1117_p0) target bundleno = 550 (0x226), region = 92  ;;  %s1118_s16 = sld [smem:[#allocation11 + $0x2]] (!%p1117_p0) }
 0x20e   : > { %v605_v24 = vstv %s604_s27  ;;  %s1119_s1 = sld [smem:[#allocation13 + $0x2]] (!%p1117_p0) }
 0x20f   : > { %vm606_vm1 = vcmp.eq.s32.totalorder %v605_v24, 1 }
 0x210   : > { %v607_v26 = vsel %vm606_vm1, %v1770_v10, %v1753_v0  ;;  %v608_v27 = vsel %vm606_vm1, %v1772_v11, %v1755_v1  ;;  %v609_v28 = vsel %vm606_vm1, %v1774_v12, %v1757_v2  ;;  %v610_v29 = vsel %vm606_vm1, %v1776_v13, %v1761_v4 }
 0x211   : > { %613 = vst [vmem:[#allocation2] sm:$0xff] %v607_v26  ;;  %614 = vst [vmem:[#allocation2 + $0x8] sm:$0xff] %v608_v27  ;;  %v611_v30 = vsel %vm606_vm1, %v1779_v15, %v1764_v6  ;;  %v612_v31 = vsel %vm606_vm1, %v1781_v16, %v1767_v8 }
 0x212   : > { %615 = vst [vmem:[#allocation2 + $0x10] sm:$0xff] %v609_v28  ;;  %616 = vst [vmem:[#allocation2 + $0x18] sm:$0xff] %v610_v29 }
 0x213   : > { %617 = vst [vmem:[#allocation2 + $0x20] sm:$0xff] %v611_v30  ;;  %618 = vst [vmem:[#allocation2 + $0x28] sm:$0xff] %v612_v31  ;;  %v632_v38 = vstv (!%p1117_p0), %s1118_s16 }
 0x214   : > { %v640_v39 = vstv %s1119_s1  ;;  %s647_s12 = ssub.f32 1.0, %s1119_s1  ;;  %v639_v41 = vmul.f32 %v632_v38, %v1798_v25 }
 0x216   : > { %v648_v44 = vstv %s647_s12 }
 0x217   : > { %v649_v49 = vmul.f32 %v648_v44, %v639_v41 }
 0x218   : > { %v626_v32 = vld [vmem:[#allocation2] sm:$0xff]  ;;  %v627_v33 = vld [vmem:[#allocation2 + $0x8] sm:$0xff] }
 0x219   : > { %v628_v34 = vld [vmem:[#allocation2 + $0x10] sm:$0xff]  ;;  %v629_v35 = vld [vmem:[#allocation2 + $0x18] sm:$0xff]  ;;  %v633_v40 = vmul.f32 %v632_v38, %v626_v32  ;;  %v634_v42 = vmul.f32 %v632_v38, %v627_v33 }
 0x21a   : > { %v630_v36 = vld [vmem:[#allocation2 + $0x20] sm:$0xff]  ;;  %v631_v37 = vld [vmem:[#allocation2 + $0x28] sm:$0xff]  ;;  %v635_v43 = vmul.f32 %v632_v38, %v628_v34  ;;  %v636_v45 = vmul.f32 %v632_v38, %v629_v35 }
 0x21b   : > { %v637_v46 = vmul.f32 %v632_v38, %v630_v36  ;;  %v638_v47 = vmul.f32 %v632_v38, %v631_v37  ;;  %v641_v48 = vmul.f32 %v640_v39, %v633_v40  ;;  %v642_v50 = vmul.f32 %v640_v39, %v634_v42 }
 0x21c   : > { %v643_v51 = vmul.f32 %v640_v39, %v635_v43  ;;  %v644_v52 = vmul.f32 %v640_v39, %v636_v45 }
 0x21d   : > { %v645_v53 = vmul.f32 %v640_v39, %v637_v46  ;;  %v646_v54 = vmul.f32 %v640_v39, %v638_v47  ;;  %v650_v55 = vadd.f32 %v649_v49, %v641_v48  ;;  %v651_v56 = vadd.f32 %v649_v49, %v642_v50 }
 0x21e   : > { %v652_v57 = vadd.f32 %v649_v49, %v643_v51  ;;  %v653_v58 = vadd.f32 %v649_v49, %v644_v52 }
 0x21f   : > { %v654_v59 = vadd.f32 %v649_v49, %v645_v53  ;;  %v655_v60 = vadd.f32 %v649_v49, %v646_v54  ;;  %v656_v61 = vmax.f32 %v650_v55, 0.0  ;;  %v657_v62 = vmax.f32 %v651_v56, 0.0 }
 0x220   : > { %v658_v63 = vmax.f32 %v652_v57, 0.0  ;;  %v659_v3 = vmax.f32 %v653_v58, 0.0 }
 0x221   : > { %v660_v5 = vmax.f32 %v654_v59, 0.0  ;;  %v661_v7 = vmax.f32 %v655_v60, 0.0  ;;  %v662_v9 = vmin.f32 %v656_v61, 1.0  ;;  %v663_v14 = vmin.f32 %v657_v62, 1.0 }
 0x222   : > { %v664_v17 = vmin.f32 %v658_v63, 1.0  ;;  %v665_v24 = vmin.f32 %v659_v3, 1.0 }
 0x223   : > { %v666_v26 = vmin.f32 %v660_v5, 1.0  ;;  %v667_v27 = vmin.f32 %v661_v7, 1.0  ;;  %668 = vst [vmem:[#allocation2] sm:$0xff] %v662_v9  ;;  %669 = vst [vmem:[#allocation2 + $0x8] sm:$0xff] %v663_v14 }
 0x224   : > { %670 = vst [vmem:[#allocation2 + $0x10] sm:$0xff] %v664_v17  ;;  %671 = vst [vmem:[#allocation2 + $0x18] sm:$0xff] %v665_v24 }
 0x225   : > { %672 = vst [vmem:[#allocation2 + $0x20] sm:$0xff] %v666_v26  ;;  %673 = vst [vmem:[#allocation2 + $0x28] sm:$0xff] %v667_v27 }
 0x226 PF: > { %s1120_s18 = sld [smem:[#allocation10 + $0x3]] }
 0x22c   : > { %p1121_p12 = scmp.eq.s32.totalorder %s1120_s18, 0 }
 0x22d   : > { %s1122_s20 = sld [smem:[#allocation11 + $0x3]] (!%p1121_p12)  ;;  %v681_v28 = vld [vmem:[#allocation2] sm:$0xff] (!%p1121_p12)  ;;  %v682_v29 = vld [vmem:[#allocation2 + $0x8] sm:$0xff] (!%p1121_p12)  ;;  %v683_v30 = vld [vmem:[#allocation2 + $0x10] sm:$0xff] (!%p1121_p12) }
 0x22e   : > { %678 = sbr.rel (%p1121_p12) target bundleno = 731 (0x2db), region = 96  ;;  %v684_v31 = vld [vmem:[#allocation2 + $0x18] sm:$0xff] (!%p1121_p12)  ;;  %v685_v36 = vld [vmem:[#allocation2 + $0x20] sm:$0xff] (!%p1121_p12)  ;;  %v686_v39 = vld [vmem:[#allocation2 + $0x28] sm:$0xff] (!%p1121_p12)  ;;  %s1123_s14 = sld [smem:[#allocation13 + $0x3]] (!%p1121_p12) }
 0x233   : > { %v687_v32 = vstv (!%p1121_p12), %s1122_s20 }
 0x234   : > { %v688_v33 = vmul.f32 (!%p1121_p12), %v687_v32, %v681_v28  ;;  %v689_v34 = vmul.f32 (!%p1121_p12), %v687_v32, %v682_v29  ;;  %v690_v35 = vmul.f32 (!%p1121_p12), %v687_v32, %v683_v30  ;;  %v691_v37 = vmul.f32 (!%p1121_p12), %v687_v32, %v684_v31  ;;  %s709_s15 = ssub.f32 (!%p1121_p12), 1.0, %s1123_s14 }
 0x235   : > { %v692_v40 = vmul.f32 %v687_v32, %v685_v36  ;;  %v693_v42 = vmul.f32 %v687_v32, %v686_v39  ;;  %v702_v46 = vstv %s1123_s14 }
 0x236   : > { %v694_v38 = vadd.f32 %v689_v34, %v688_v33  ;;  %v703_v47 = vmul.f32 %v702_v46, %v688_v33  ;;  %v710_v49 = vstv %s709_s15  ;;  %v704_v50 = vmul.f32 %v702_v46, %v689_v34 }
 0x237   : > { %v705_v51 = vmul.f32 %v702_v46, %v690_v35  ;;  %v706_v52 = vmul.f32 %v702_v46, %v691_v37  ;;  %v707_v54 = vmul.f32 %v702_v46, %v692_v40  ;;  %v708_v55 = vmul.f32 %v702_v46, %v693_v42 }
 0x238   : > { %v695_v41 = vadd.f32 %v694_v38, %v690_v35 }
 0x23a   : > { %v696_v43 = vadd.f32 %v695_v41, %v691_v37 }
 0x23c   : > { %v697_v44 = vadd.f32 %v696_v43, %v692_v40 }
 0x23e   : > { %v698_v45 = vadd.f32 %v697_v44, %v693_v42 }
 0x240   : > { %699 = vadd.xlane.f32.xlu0 %v698_v45 }
 0x2cd   : > { %v700_v48 = vpop.xlane.xlu0 %699 }
 0x2ce   : > { %v701_v53 = vmul.f32 0.0013020834, %v700_v48 }
 0x2d0   : > { %v711_v56 = vmul.f32 %v710_v49, %v701_v53 }
 0x2d2   : > { %v712_v57 = vadd.f32 %v711_v56, %v703_v47  ;;  %v713_v58 = vadd.f32 %v711_v56, %v704_v50  ;;  %v714_v59 = vadd.f32 %v711_v56, %v705_v51  ;;  %v715_v60 = vadd.f32 %v711_v56, %v706_v52 }
 0x2d3   : > { %v716_v61 = vadd.f32 %v711_v56, %v707_v54  ;;  %v717_v62 = vadd.f32 %v711_v56, %v708_v55 }
 0x2d4   : > { %v718_v63 = vmax.f32 %v712_v57, 0.0  ;;  %v719_v3 = vmax.f32 %v713_v58, 0.0  ;;  %v720_v5 = vmax.f32 %v714_v59, 0.0  ;;  %v721_v7 = vmax.f32 %v715_v60, 0.0 }
 0x2d5   : > { %v722_v9 = vmax.f32 %v716_v61, 0.0  ;;  %v723_v14 = vmax.f32 %v717_v62, 0.0 }
 0x2d6   : > { %v724_v17 = vmin.f32 %v718_v63, 1.0  ;;  %v725_v24 = vmin.f32 %v719_v3, 1.0  ;;  %v726_v26 = vmin.f32 %v720_v5, 1.0  ;;  %v727_v27 = vmin.f32 %v721_v7, 1.0 }
 0x2d7   : > { %v728_v28 = vmin.f32 %v722_v9, 1.0  ;;  %v729_v29 = vmin.f32 %v723_v14, 1.0 }
 0x2d8   : > { %730 = vst [vmem:[#allocation2] sm:$0xff] %v724_v17  ;;  %731 = vst [vmem:[#allocation2 + $0x8] sm:$0xff] %v725_v24 }
 0x2d9   : > { %732 = vst [vmem:[#allocation2 + $0x10] sm:$0xff] %v726_v26  ;;  %733 = vst [vmem:[#allocation2 + $0x18] sm:$0xff] %v727_v27 }
 0x2da   : > { %734 = vst [vmem:[#allocation2 + $0x20] sm:$0xff] %v728_v28  ;;  %735 = vst [vmem:[#allocation2 + $0x28] sm:$0xff] %v729_v29 }
 0x2db PF: > { %s1124_s25 = sld [smem:[#allocation4 + $0x1]]  ;;  %s1125_s17 = sld [smem:[#allocation8 + $0x2]] }
 0x2dc   : > { %s1832_s0 = sld [smem:[#allocation10 + $0x4]] }
 0x2df   : > { %v737_v30 = vld [vmem:[#allocation2] sm:$0xff]  ;;  %v738_v31 = vld [vmem:[#allocation2 + $0x8] sm:$0xff] }
 0x2e0   : > { %v739_v32 = vld [vmem:[#allocation2 + $0x10] sm:$0xff]  ;;  %v740_v33 = vld [vmem:[#allocation2 + $0x18] sm:$0xff] }
 0x2e1   : > { %v741_v34 = vld [vmem:[#allocation2 + $0x20] sm:$0xff]  ;;  %v742_v35 = vld [vmem:[#allocation2 + $0x28] sm:$0xff]  ;;  %v743_v36 = vstv %s1124_s25  ;;  %p757_p7 = scmp.gt.s32.totalorder %s1125_s17, 0 }
 0x2e2   : > { %v744_v37 = vmul.f32 %v743_v36, %v737_v30  ;;  %v745_v38 = vmul.f32 %v743_v36, %v738_v31  ;;  %v746_v39 = vmul.f32 %v743_v36, %v739_v32  ;;  %v747_v40 = vmul.f32 %v743_v36, %v740_v33  ;;  %p1127_p2 = scmp.eq.s32.totalorder %s1832_s0, 0 }
 0x2e3   : > { %s758_s19 = scalar_select %p757_p7, 1, 0  ;;  %v748_v41 = vmul.f32 %v743_v36, %v741_v34  ;;  %v749_v42 = vmul.f32 %v743_v36, %v742_v35 }
 0x2e4   : > { %v1835_v43 = vadd.f32 %v744_v37, %v1806_v18  ;;  %v1838_v44 = vadd.f32 %v745_v38, %v1808_v19  ;;  %v1841_v45 = vadd.f32 %v746_v39, %v1810_v20  ;;  %v1844_v46 = vadd.f32 %v747_v40, %v1812_v21  ;;  %777 = sbr.rel (%p1127_p2) target bundleno = 765 (0x2fd), region = 100  ;;  %s1128_s27 = sld [smem:[#allocation11 + $0x4]] (!%p1127_p2) }
 0x2e5   : > { %v759_v47 = vstv %s758_s19  ;;  %v1847_v48 = vadd.f32 %v748_v41, %v1814_v22  ;;  %v1850_v49 = vadd.f32 %v749_v42, %v1816_v23  ;;  %s1129_s16 = sld [smem:[#allocation13 + $0x4]] (!%p1127_p2) }
 0x2e6   : > { %vm760_vm2 = vcmp.eq.s32.totalorder %v759_v47, 1 }
 0x2e7   : > { %v761_v18 = vsel %vm760_vm2, %v1770_v10, %v1753_v0  ;;  %v762_v19 = vsel %vm760_vm2, %v1772_v11, %v1755_v1  ;;  %v763_v20 = vsel %vm760_vm2, %v1774_v12, %v1757_v2  ;;  %v764_v21 = vsel %vm760_vm2, %v1776_v13, %v1761_v4 }
 0x2e8   : > { %767 = vst [vmem:[#allocation2] sm:$0xff] %v761_v18  ;;  %768 = vst [vmem:[#allocation2 + $0x8] sm:$0xff] %v762_v19  ;;  %v765_v22 = vsel %vm760_vm2, %v1779_v15, %v1764_v6  ;;  %v766_v23 = vsel %vm760_vm2, %v1781_v16, %v1767_v8 }
 0x2e9   : > { %769 = vst [vmem:[#allocation2 + $0x10] sm:$0xff] %v763_v20  ;;  %770 = vst [vmem:[#allocation2 + $0x18] sm:$0xff] %v764_v21 }
 0x2ea   : > { %771 = vst [vmem:[#allocation2 + $0x20] sm:$0xff] %v765_v22  ;;  %772 = vst [vmem:[#allocation2 + $0x28] sm:$0xff] %v766_v23  ;;  %v786_v52 = vstv (!%p1127_p2), %s1128_s27 }
 0x2eb   : > { %v794_v53 = vstv %s1129_s16  ;;  %s801_s1 = ssub.f32 1.0, %s1129_s16  ;;  %v793_v54 = vmul.f32 %v786_v52, %v1798_v25 }
 0x2ed   : > { %v802_v56 = vstv %s801_s1 }
 0x2ee   : > { %v803_v61 = vmul.f32 %v802_v56, %v793_v54 }
 0x2ef   : > { %v780_v10 = vld [vmem:[#allocation2] sm:$0xff]  ;;  %v781_v11 = vld [vmem:[#allocation2 + $0x8] sm:$0xff] }
 0x2f0   : > { %v782_v12 = vld [vmem:[#allocation2 + $0x10] sm:$0xff]  ;;  %v783_v13 = vld [vmem:[#allocation2 + $0x18] sm:$0xff]  ;;  %v787_v15 = vmul.f32 %v786_v52, %v780_v10  ;;  %v788_v16 = vmul.f32 %v786_v52, %v781_v11 }
 0x2f1   : > { %v784_v50 = vld [vmem:[#allocation2 + $0x20] sm:$0xff]  ;;  %v785_v51 = vld [vmem:[#allocation2 + $0x28] sm:$0xff]  ;;  %v789_v55 = vmul.f32 %v786_v52, %v782_v12  ;;  %v790_v57 = vmul.f32 %v786_v52, %v783_v13 }
 0x2f2   : > { %v791_v58 = vmul.f32 %v786_v52, %v784_v50  ;;  %v792_v59 = vmul.f32 %v786_v52, %v785_v51  ;;  %v795_v60 = vmul.f32 %v794_v53, %v787_v15  ;;  %v796_v62 = vmul.f32 %v794_v53, %v788_v16 }
 0x2f3   : > { %v797_v63 = vmul.f32 %v794_v53, %v789_v55  ;;  %v798_v3 = vmul.f32 %v794_v53, %v790_v57 }
 0x2f4   : > { %v799_v5 = vmul.f32 %v794_v53, %v791_v58  ;;  %v800_v7 = vmul.f32 %v794_v53, %v792_v59  ;;  %v804_v9 = vadd.f32 %v803_v61, %v795_v60  ;;  %v805_v14 = vadd.f32 %v803_v61, %v796_v62 }
 0x2f5   : > { %v806_v17 = vadd.f32 %v803_v61, %v797_v63  ;;  %v807_v24 = vadd.f32 %v803_v61, %v798_v3 }
 0x2f6   : > { %v808_v26 = vadd.f32 %v803_v61, %v799_v5  ;;  %v809_v27 = vadd.f32 %v803_v61, %v800_v7  ;;  %v810_v25 = vmax.f32 %v804_v9, 0.0  ;;  %v811_v28 = vmax.f32 %v805_v14, 0.0 }
 0x2f7   : > { %v812_v29 = vmax.f32 %v806_v17, 0.0  ;;  %v813_v30 = vmax.f32 %v807_v24, 0.0 }
 0x2f8   : > { %v814_v31 = vmax.f32 %v808_v26, 0.0  ;;  %v815_v32 = vmax.f32 %v809_v27, 0.0  ;;  %v816_v33 = vmin.f32 %v810_v25, 1.0  ;;  %v817_v34 = vmin.f32 %v811_v28, 1.0 }
 0x2f9   : > { %v818_v35 = vmin.f32 %v812_v29, 1.0  ;;  %v819_v36 = vmin.f32 %v813_v30, 1.0 }
 0x2fa   : > { %v820_v37 = vmin.f32 %v814_v31, 1.0  ;;  %v821_v38 = vmin.f32 %v815_v32, 1.0  ;;  %822 = vst [vmem:[#allocation2] sm:$0xff] %v816_v33  ;;  %823 = vst [vmem:[#allocation2 + $0x8] sm:$0xff] %v817_v34 }
 0x2fb   : > { %824 = vst [vmem:[#allocation2 + $0x10] sm:$0xff] %v818_v35  ;;  %825 = vst [vmem:[#allocation2 + $0x18] sm:$0xff] %v819_v36 }
 0x2fc   : > { %826 = vst [vmem:[#allocation2 + $0x20] sm:$0xff] %v820_v37  ;;  %827 = vst [vmem:[#allocation2 + $0x28] sm:$0xff] %v821_v38 }
 0x2fd PF: > { %s1130_s12 = sld [smem:[#allocation10 + $0x5]] }
 0x303   : > { %p1131_p8 = scmp.eq.s32.totalorder %s1130_s12, 0 }
 0x304   : > { %s1132_s18 = sld [smem:[#allocation11 + $0x5]] (!%p1131_p8)  ;;  %v835_v39 = vld [vmem:[#allocation2] sm:$0xff] (!%p1131_p8)  ;;  %v836_v40 = vld [vmem:[#allocation2 + $0x8] sm:$0xff] (!%p1131_p8)  ;;  %v837_v41 = vld [vmem:[#allocation2 + $0x10] sm:$0xff] (!%p1131_p8) }
 0x305   : > { %832 = sbr.rel (%p1131_p8) target bundleno = 946 (0x3b2), region = 104  ;;  %v838_v42 = vld [vmem:[#allocation2 + $0x18] sm:$0xff] (!%p1131_p8)  ;;  %v839_v21 = vld [vmem:[#allocation2 + $0x20] sm:$0xff] (!%p1131_p8)  ;;  %v840_v10 = vld [vmem:[#allocation2 + $0x28] sm:$0xff] (!%p1131_p8)  ;;  %s1133_s20 = sld [smem:[#allocation13 + $0x5]] (!%p1131_p8) }
 0x30a   : > { %v841_v47 = vstv (!%p1131_p8), %s1132_s18 }
 0x30b   : > { %v842_v18 = vmul.f32 (!%p1131_p8), %v841_v47, %v835_v39  ;;  %v843_v19 = vmul.f32 (!%p1131_p8), %v841_v47, %v836_v40  ;;  %v844_v20 = vmul.f32 (!%p1131_p8), %v841_v47, %v837_v41  ;;  %v845_v22 = vmul.f32 (!%p1131_p8), %v841_v47, %v838_v42  ;;  %s863_s14 = ssub.f32 (!%p1131_p8), 1.0, %s1133_s20 }
 0x30c   : > { %v846_v11 = vmul.f32 %v841_v47, %v839_v21  ;;  %v847_v13 = vmul.f32 %v841_v47, %v840_v10  ;;  %v856_v53 = vstv %s1133_s20 }
 0x30d   : > { %v848_v23 = vadd.f32 %v843_v19, %v842_v18  ;;  %v857_v15 = vmul.f32 %v856_v53, %v842_v18  ;;  %v864_v16 = vstv %s863_s14  ;;  %v858_v55 = vmul.f32 %v856_v53, %v843_v19 }
 0x30e   : > { %v859_v56 = vmul.f32 %v856_v53, %v844_v20  ;;  %v860_v57 = vmul.f32 %v856_v53, %v845_v22  ;;  %v861_v59 = vmul.f32 %v856_v53, %v846_v11  ;;  %v862_v60 = vmul.f32 %v856_v53, %v847_v13 }
 0x30f   : > { %v849_v12 = vadd.f32 %v848_v23, %v844_v20 }
 0x311   : > { %v850_v50 = vadd.f32 %v849_v12, %v845_v22 }
 0x313   : > { %v851_v51 = vadd.f32 %v850_v50, %v846_v11 }
 0x315   : > { %v852_v52 = vadd.f32 %v851_v51, %v847_v13 }
 0x317   : > { %853 = vadd.xlane.f32.xlu0 %v852_v52 }
 0x3a4   : > { %v854_v54 = vpop.xlane.xlu0 %853 }
 0x3a5   : > { %v855_v58 = vmul.f32 0.0013020834, %v854_v54 }
 0x3a7   : > { %v865_v61 = vmul.f32 %v864_v16, %v855_v58 }
 0x3a9   : > { %v866_v62 = vadd.f32 %v865_v61, %v857_v15  ;;  %v867_v63 = vadd.f32 %v865_v61, %v858_v55  ;;  %v868_v3 = vadd.f32 %v865_v61, %v859_v56  ;;  %v869_v5 = vadd.f32 %v865_v61, %v860_v57 }
 0x3aa   : > { %v870_v7 = vadd.f32 %v865_v61, %v861_v59  ;;  %v871_v9 = vadd.f32 %v865_v61, %v862_v60 }
 0x3ab   : > { %v872_v14 = vmax.f32 %v866_v62, 0.0  ;;  %v873_v17 = vmax.f32 %v867_v63, 0.0  ;;  %v874_v24 = vmax.f32 %v868_v3, 0.0  ;;  %v875_v26 = vmax.f32 %v869_v5, 0.0 }
 0x3ac   : > { %v876_v27 = vmax.f32 %v870_v7, 0.0  ;;  %v877_v25 = vmax.f32 %v871_v9, 0.0 }
 0x3ad   : > { %v878_v28 = vmin.f32 %v872_v14, 1.0  ;;  %v879_v29 = vmin.f32 %v873_v17, 1.0  ;;  %v880_v30 = vmin.f32 %v874_v24, 1.0  ;;  %v881_v31 = vmin.f32 %v875_v26, 1.0 }
 0x3ae   : > { %v882_v32 = vmin.f32 %v876_v27, 1.0  ;;  %v883_v33 = vmin.f32 %v877_v25, 1.0 }
 0x3af   : > { %884 = vst [vmem:[#allocation2] sm:$0xff] %v878_v28  ;;  %885 = vst [vmem:[#allocation2 + $0x8] sm:$0xff] %v879_v29 }
 0x3b0   : > { %886 = vst [vmem:[#allocation2 + $0x10] sm:$0xff] %v880_v30  ;;  %887 = vst [vmem:[#allocation2 + $0x18] sm:$0xff] %v881_v31 }
 0x3b1   : > { %888 = vst [vmem:[#allocation2 + $0x20] sm:$0xff] %v882_v32  ;;  %889 = vst [vmem:[#allocation2 + $0x28] sm:$0xff] %v883_v33 }
 0x3b2 PF: > { %s1134_s15 = sld [smem:[#allocation4 + $0x2]]  ;;  %v910_v35 = vstv %s447_s23  ;;  %v917_v47 = vstv %s1795_s22  ;;  %s1143_s22 = smul.u32 768, %s1545_s13 }
 0x3b3   : > { %v911_v42 = vmul.f32 %v910_v35, %v1753_v0  ;;  %v912_v18 = vmul.f32 %v910_v35, %v1755_v1  ;;  %v913_v23 = vmul.f32 %v910_v35, %v1757_v2  ;;  %v914_v10 = vmul.f32 %v910_v35, %v1761_v4  ;;  %s951_s23 = sshll.u32 %s1801_s21, 4  ;;  %s937_s0 = scalar_lea.sflag [#allocation6], %s1736_s2  ;;  %s1888_s23 = int_to_ptr.vmem [resolvable:$true] %s951_s23 }
 0x3b4   : > { %v915_v52 = vmul.f32 %v910_v35, %v1764_v6  ;;  %v916_v2 = vmul.f32 %v910_v35, %v1767_v8  ;;  %s1886_s17 = scalar_lea.hbm %s1944_s8, %s1143_s22  ;;  %s1381_s19 = scalar_lea.vmem %s1888_s23, 768 }
 0x3b5   : > { %p1382_p4 = scmp.ne.s32.totalorder %s1888_s23, %s1381_s19  ;;  %p1971_p13 = scmp.ne.s32.totalorder %s1959_s28, 0 }
 0x3b6   : > { %v891_v34 = vld [vmem:[#allocation2] sm:$0xff]  ;;  %v892_v36 = vld [vmem:[#allocation2 + $0x8] sm:$0xff]  ;;  %s1472_s27 = smov [#allocation17]  }
 0x3b7   : > { %v893_v37 = vld [vmem:[#allocation2 + $0x10] sm:$0xff]  ;;  %v894_v38 = vld [vmem:[#allocation2 + $0x18] sm:$0xff]  ;;  %p1383_p5 = pnand %p1382_p4, %p1971_p13  ;;  %s1385_s16 = sshll.u32 %s1472_s27, 4  ;;  %s1386_s16 = int_to_ptr.vmem [resolvable:$false] %s1385_s16 }
 0x3b8   : > { %v895_v39 = vld [vmem:[#allocation2 + $0x20] sm:$0xff]  ;;  %v896_v40 = vld [vmem:[#allocation2 + $0x28] sm:$0xff]  ;;  %v897_v41 = vstv %s1134_s15  ;;  %s1387_s1 = scalar_lea.vmem %s1386_s16, 1536  ;;  %p1388_p9 = scmp.lt.s32.totalorder %s1888_s23, %s1386_s16 }
 0x3b9   : > { %v898_v19 = vmul.f32 %v897_v41, %v891_v34  ;;  %v899_v20 = vmul.f32 %v897_v41, %v892_v36  ;;  %v900_v21 = vmul.f32 %v897_v41, %v893_v37  ;;  %v901_v22 = vmul.f32 %v897_v41, %v894_v38  ;;  %p1384_p3 = pneg %p1383_p5  ;;  %p1389_p10 = scmp.lt.s32.totalorder %s1387_s1, %s1381_s19 }
 0x3ba   : > { %v902_v11 = vmul.f32 %v897_v41, %v895_v39  ;;  %v903_v12 = vmul.f32 %v897_v41, %v896_v40 }
 0x3bb   : > { %v904_v13 = vadd.f32 %v898_v19, %v1835_v43  ;;  %v905_v50 = vadd.f32 %v899_v20, %v1838_v44  ;;  %v906_v0 = vadd.f32 %v900_v21, %v1841_v45  ;;  %v907_v1 = vadd.f32 %v901_v22, %v1844_v46  ;;  %p1390_p11 = por %p1389_p10, %p1388_p9 }
 0x3bc   : > { %v908_v51 = vadd.f32 %v902_v11, %v1847_v48  ;;  %v909_v53 = vadd.f32 %v903_v12, %v1850_v49 }
 0x3bd   : > { %v918_v4 = vmul.f32 %v917_v47, %v904_v13  ;;  %v919_v15 = vmul.f32 %v917_v47, %v905_v50  ;;  %v920_v43 = vmul.f32 %v917_v47, %v906_v0  ;;  %v921_v44 = vmul.f32 %v917_v47, %v907_v1  ;;  %p1391_p6 = pnand %p1390_p11, %p1384_p3 }
 0x3be   : > { %v922_v45 = vmul.f32 %v917_v47, %v908_v51  ;;  %v923_v46 = vmul.f32 %v917_v47, %v909_v53 }
 0x3bf   : > { %v924_v6 = vadd.f32 %v918_v4, %v911_v42  ;;  %v925_v48 = vadd.f32 %v919_v15, %v912_v18  ;;  %v926_v49 = vadd.f32 %v920_v43, %v913_v23  ;;  %v927_v8 = vadd.f32 %v921_v44, %v914_v10 }
 0x3c0   : > { %v928_v54 = vadd.f32 %v922_v45, %v915_v52  ;;  %v929_v16 = vadd.f32 %v923_v46, %v916_v2 }
 0x3c1   : > { %930 = vst [vmem:[%s1801_s21] sm:$0xff] %v924_v6  ;;  %931 = vst [vmem:[%s1801_s21 + $0x8] sm:$0xff] %v925_v48 }
 0x3c2   : > { %932 = vst [vmem:[%s1801_s21 + $0x10] sm:$0xff] %v926_v49  ;;  %933 = vst [vmem:[%s1801_s21 + $0x18] sm:$0xff] %v927_v8 }
 0x3c3   : > { %934 = vst [vmem:[%s1801_s21 + $0x20] sm:$0xff] %v928_v54  ;;  %935 = vst [vmem:[%s1801_s21 + $0x28] sm:$0xff] %v929_v16 }
 0x3c4   : > { %1394 = shalt.err (!%p1391_p6)
}
 0x3c5   : > { %s1395_s2 = scalar_lea.hbm %s1886_s17, 768  ;;  %s1399_s18 = scalar_lea.hbm %s1944_s8, 1536 }
 0x3c6   : > { %p1396_p1 = scmp.ne.s32.totalorder %s1886_s17, %s1395_s2  ;;  %p1400_p7 = scmp.lt.u32.totalorder %s1886_s17, %s1944_s8 }
 0x3c7   : > { %p1401_p2 = scmp.lt.u32.totalorder %s1399_s18, %s1395_s2  ;;  %p1403_p4 = scmp.lt.u32.totalorder %s1395_s2, %s1886_s17 }
 0x3c8   : > { %p1397_p0 = pnand %p1396_p1, %p1971_p13 }
 0x3c9   : > { %p1402_p8 = por %p1401_p2, %p1400_p7 }
 0x3ca   : > { %p1398_p12 = pneg %p1397_p0 }
 0x3cb   : > { %p1404_p5 = por %p1403_p4, %p1402_p8 }
 0x3cd   : > { %p1405_p3 = pnand %p1404_p5, %p1398_p12 }
 0x3cf   : > { %1408 = shalt.err (!%p1405_p3)
}
 0x3d0   : > { %1168 = dma.vmem_to_hbm [thread:$0]  (%p1971_p13), %s1888_s23, 768, %s1886_s17, %s937_s0  }
 0x3d1 PF: > { %s963_s15 = sand.u32 1, %s1451_s29   ;;  %p1972_p9 = scmp.ne.s32.totalorder %s1960_s11, 0 }
 0x3d2   : > { %p1973_p10 = scmp.ge.s32.totalorder %s1463_s10, 2  ;;  %s964_s22 = scalar_lea.sflag [#allocation6], %s963_s15 }
 0x3d4   : > { %p1194_p11 = pnand %p1973_p10, %p1972_p9 }
 0x3d6   : > { %1446 = dma.done.wait (!%p1194_p11), %s964_s22, 768  }
 0x3d7   : > { %1448 = vsyncadd (!%p1194_p11), %s964_s22, 4294966528  ;;  %p28_p6 = scmp.ge.s32.totalorder %s1617_s24, 4   ;;  %s1974_s29 = smov %s1455_s30 }
 0x3d8   : > { %s1975_s30 = smov %s1459_s9  ;;  %s1976_s9 = smov %s1629_s26 }
 0x3d9   : > { %s1977_s10 = smov %s1617_s24  ;;  %30 = sbr.rel (!%p28_p6) target bundleno = 14 (0xe), region = 155 }
 0x3e0   :  { %969 = vsyncpa [#allocation5], 1 }
 0x3e1   :  { %971 = vsyncpa [#allocation5 + $0x1], 1 }
 0x3e2   :  { %972 = vsyncpa [#allocation16], 1 }
 0x3e3   :  { %974 = vsyncpa [#allocation16 + $0x1], 1 }
 0x3e4   :  { %975 = vsyncpa [#allocation6], 1 }
 0x3e5   :  { %977 = vsyncpa [#allocation6 + $0x1], 1 }
 0x3e6   :  { %978 = vsyncpa [#allocation7], 1 }
 0x3e7   :  { %980 = vsyncpa [#allocation7 + $0x1], 1 }
 0x3e8   :  { %981 = vsyncpa [#allocation9], 1 }
 0x3e9   :  { %982 = vsyncpa [#allocation12], 1 }

</bundles_post_ra>
